<compile_context>
chip_gen: v7x
topology: tpu7x:2x2x1
jax: 0.10.0
libtpu: 0.0.40
codegen_flags: <defaults>
</compile_context>

<pallas_src>
import functools

import jax
import jax.numpy as jnp
from jax.experimental import pallas as pl
from jax.experimental.pallas import tpu as pltpu


def _round_up(x, m):
    return ((x + m - 1) // m) * m


# ----------------------------- kernel ---------------------------------------

def _critic_kernel(sa_ref, w1_ref, b1_ref, w2_ref, wa_ref, b2_ref, w3_ref, b3_ref,
                   q_ref, *, state_size):
    """Feature-major twin-Q forward for one batch tile.

    sa_ref : (S+A, TB)   merged [state ; action], compute dtype
    w1_ref : (2*h1, S)   b1_ref : (2*h1, 1)  fp32
    w2_ref : (2*h2, 2*h1) block-diagonal     wa_ref : (2*h2, A)   b2_ref : (2*h2, 1) fp32
    w3_ref : (2, 2*h2)    block-diagonal     b3_ref : (2, 1)      fp32
    q_ref  : (2, TB)      row 0 = q1, row 1 = q2 (lane-dense store)
    """
    sa = sa_ref[...]
    s = sa[:state_size, :]                 # (S, TB)
    a = sa[state_size:, :]                 # (A, TB)

    # layer 1 (both heads fused along the output axis): (2*h1, TB), fp32 accumulate
    h = jnp.dot(w1_ref[...], s, preferred_element_type=jnp.float32) + b1_ref[...]
    h = jnp.maximum(h, 0.0).astype(w2_ref.dtype)

    # layer 2: block-diagonal hidden path + shared action path: (2*h2, TB)
    g = (jnp.dot(w2_ref[...], h, preferred_element_type=jnp.float32)
         + jnp.dot(wa_ref[...], a, preferred_element_type=jnp.float32)
         + b2_ref[...])
    g = jnp.maximum(g, 0.0).astype(w3_ref.dtype)

    # output layer: (2, TB) -> unmasked lane-dense store
    q_ref[...] = (jnp.dot(w3_ref[...], g, preferred_element_type=jnp.float32)
                  + b3_ref[...]).astype(q_ref.dtype)


# ----------------------------- wrapper ---------------------------------------

@functools.partial(jax.jit,
                   static_argnames=("block_b", "compute_dtype", "min_grid_steps"))
def critic_forward(state, action, packed, *, block_b=1024,
                   compute_dtype=jnp.bfloat16, min_grid_steps=1):
    """Returns (q1, q2), each (B, 1) float32.

    block_b        : max batch-tile width (lanes).  Overhead-bound kernel => prefer one
                     big tile; value is clamped and rounded to a multiple of 128.
    min_grid_steps : set to 2 on v7x so the "parallel" batch axis can be sharded across
                     both TensorCores; leave at 1 on v5e/v6e.
    """
    W1t, B1t, W2t, WAt, B2t, W3t, B3t = packed
    B, S = state.shape
    A = action.shape[1]

    # One merged feature-major input slab (S+A, B): single DMA stream, lane-dense rows.
    sa = jnp.concatenate([state.T, action.T], axis=0).astype(compute_dtype)

    # Batch tiling: fewest grid steps possible (>= min_grid_steps), tiles multiple of 128
    # so both the input DMA and the (2, tile_b) output store are unmasked/lane-dense.
    block_b = max(128, (min(int(block_b), 4096) // 128) * 128)
    Bp = _round_up(B, 128)
    steps = max(int(min_grid_steps), -(-Bp // block_b))     # ceil div
    tile_b = _round_up(-(-Bp // steps), 128)
    Bp = tile_b * steps
    if Bp != B:
        sa = jnp.pad(sa, ((0, 0), (0, Bp - B)))

    # Weights/activations in compute dtype (bf16 MXU fast path on v6e/v7x); biases stay
    # fp32 and are added to the fp32 MXU accumulators inside the kernel.
    W1c = W1t.astype(compute_dtype)
    W2c = W2t.astype(compute_dtype)
    WAc = WAt.astype(compute_dtype)
    W3c = W3t.astype(compute_dtype)

    def resident(arr):
        # Weights/biases stay VMEM-resident across grid steps (constant index_map);
        # total resident footprint is <1 MiB, so no vmem_limit override is needed.
        return pl.BlockSpec(arr.shape, lambda i: (0, 0))

    q_t = pl.pallas_call(
        functools.partial(_critic_kernel, state_size=S),
        out_shape=jax.ShapeDtypeStruct((2, Bp), jnp.float32),
        grid=(steps,),
        in_specs=[pl.BlockSpec((S + A, tile_b), lambda i: (0, i)),
                  resident(W1c), resident(B1t),
                  resident(W2c), resident(WAc), resident(B2t),
                  resident(W3c), resident(B3t)],
        out_specs=pl.BlockSpec((2, tile_b), lambda i: (0, i)),
        compiler_params=pltpu.CompilerParams(
            dimension_semantics=("parallel",)),
    )(sa, W1c, B1t, W2c, WAc, B2t, W3c, B3t)

    q1 = q_t[0, :B][:, None]
    q2 = q_t[1, :B][:, None]
    return q1, q2


# ----------------------------- params ----------------------------------------

def init_critic_params(key, state_size, action_size, h1=128, h2=128):
    """Deterministic init mirroring Critic.reset_weights() distributions.

    Weights are stored transposed vs. nn.Linear, i.e. (in_features, out_features).
    fc1/fc2/fc4/fc5 ~ U(-1/sqrt(fan), +) with fan = weight.size()[0] == out_features
    (bug-for-bug parity with models.py); fc3/fc6 ~ U(-3e-3, 3e-3).
    Biases use PyTorch's default Linear init U(-1/sqrt(in_features), +).
    """
    ks = jax.random.split(key, 12)

    def u(k, shape, lim):
        return jax.random.uniform(k, shape, jnp.float32, -lim, lim)

    lim1 = 1.0 / jnp.sqrt(jnp.float32(h1))
    lim2 = 1.0 / jnp.sqrt(jnp.float32(h2))

    w1 = u(ks[0], (state_size, h1), lim1)
    b1 = u(ks[1], (1, h1), 1.0 / jnp.sqrt(jnp.float32(state_size)))
    w2 = u(ks[2], (h1 + action_size, h2), lim2)
    b2 = u(ks[3], (1, h2), 1.0 / jnp.sqrt(jnp.float32(h1 + action_size)))
    w3 = u(ks[4], (h2, 1), 3e-3)
    b3 = u(ks[5], (1, 1), 1.0 / jnp.sqrt(jnp.float32(h2)))

    w4 = u(ks[6], (state_size, h1), lim1)
    b4 = u(ks[7], (1, h1), 1.0 / jnp.sqrt(jnp.float32(state_size)))
    w5 = u(ks[8], (h1 + action_size, h2), lim2)
    b5 = u(ks[9], (1, h2), 1.0 / jnp.sqrt(jnp.float32(h1 + action_size)))
    w6 = u(ks[10], (h2, 1), 3e-3)
    b6 = u(ks[11], (1, 1), 1.0 / jnp.sqrt(jnp.float32(h2)))

    # split the post-concat layers' weights along the input axis: [hidden | action]
    w2h, w2a = w2[:h1], w2[h1:]
    w5h, w5a = w5[:h1], w5[h1:]

    return (w1, b1, w2h, w2a, b2, w3, b3,
            w4, b4, w5h, w5a, b5, w6, b6)


def pack_critic_params(raw):
    """Fuse the twin heads into wide / block-diagonal weights, stored feature-major
    (out_features, in_features) for the transposed kernel.  Exact rearrangement."""
    (w1, b1, w2h, w2a, b2, w3, b3,
     w4, b4, w5h, w5a, b5, w6, b6) = raw
    h1 = w1.shape[1]
    h2 = w2h.shape[1]
    z_hh = jnp.zeros((h2, h1), jnp.float32)
    z_1h = jnp.zeros((1, h2), jnp.float32)

    W1t = jnp.concatenate([w1, w4], axis=1).T                 # (2*h1, S)
    B1t = jnp.concatenate([b1, b4], axis=1).T                 # (2*h1, 1)
    W2t = jnp.block([[w2h.T, z_hh], [z_hh, w5h.T]])           # (2*h2, 2*h1) block-diag
    WAt = jnp.concatenate([w2a, w5a], axis=1).T               # (2*h2, A)
    B2t = jnp.concatenate([b2, b5], axis=1).T                 # (2*h2, 1)
    W3t = jnp.block([[w3.T, z_1h], [z_1h, w6.T]])             # (2, 2*h2) block-diag
    B3t = jnp.concatenate([b3, b6], axis=1).T                 # (2, 1)
    return (W1t, B1t, W2t, WAt, B2t, W3t, B3t)


# ----------------------------- reference -------------------------------------

def critic_reference(state, action, raw):
    (w1, b1, w2h, w2a, b2, w3, b3,
     w4, b4, w5h, w5a, b5, w6, b6) = raw
    x = jnp.maximum(state @ w1 + b1, 0.0)
    x = jnp.concatenate([x, action], axis=1)
    w2 = jnp.concatenate([w2h, w2a], axis=0)
    x = jnp.maximum(x @ w2 + b2, 0.0)
    q1 = x @ w3 + b3
    y = jnp.maximum(state @ w4 + b4, 0.0)
    y = jnp.concatenate([y, action], axis=1)
    w5 = jnp.concatenate([w5h, w5a], axis=0)
    y = jnp.maximum(y @ w5 + b5, 0.0)
    q2 = y @ w6 + b6
    return q1, q2


# ----------------------------- demo / check ----------------------------------

if __name__ == "__main__":
    # Tennis environment sizes: state=24, action=2.
    B, STATE_SIZE, ACTION_SIZE, H1, H2 = 256, 24, 2, 128, 128

    key = jax.random.PRNGKey(0)
    k_state, k_action, k_params = jax.random.split(key, 3)

    state = jax.random.normal(k_state, (B, STATE_SIZE), dtype=jnp.float32)
    action = jax.random.uniform(k_action, (B, ACTION_SIZE), dtype=jnp.float32,
                                minval=-1.0, maxval=1.0)
    raw = init_critic_params(k_params, STATE_SIZE, ACTION_SIZE, H1, H2)
    packed = pack_critic_params(raw)

    q1_ref, q2_ref = critic_reference(state, action, raw)

    # fp32 path (exact head fusion; tight tolerance; single grid step).
    q1, q2 = critic_forward(state, action, packed, compute_dtype=jnp.float32)
    jax.block_until_ready((q1, q2))
    assert q1.shape == (B, 1) and q2.shape == (B, 1)
    assert jnp.allclose(q1, q1_ref, atol=1e-4, rtol=1e-4)
    assert jnp.allclose(q2, q2_ref, atol=1e-4, rtol=1e-4)

    # default bf16 weight/activation path (fp32 accumulation).
    q1b, q2b = critic_forward(state, action, packed)
    jax.block_until_ready((q1b, q2b))
    assert jnp.allclose(q1b, q1_ref, atol=3e-2, rtol=3e-2)
    assert jnp.allclose(q2b, q2_ref, atol=3e-2, rtol=3e-2)

    # multi-step grid path (exercises the batch tiling / pipelining).
    q1g, q2g = critic_forward(state, action, packed,
                              block_b=128, compute_dtype=jnp.float32)
    jax.block_until_ready((q1g, q2g))
    assert jnp.allclose(q1g, q1_ref, atol=1e-4, rtol=1e-4)
    assert jnp.allclose(q2g, q2_ref, atol=1e-4, rtol=1e-4)

    # v7x-style usage: force >=2 grid steps so both TensorCores get work.
    q1t, q2t = critic_forward(state, action, packed,
                              min_grid_steps=2, compute_dtype=jnp.float32)
    jax.block_until_ready((q1t, q2t))
    assert jnp.allclose(q1t, q1_ref, atol=1e-4, rtol=1e-4)
    assert jnp.allclose(q2t, q2_ref, atol=1e-4, rtol=1e-4)

    # small / non-multiple batch goes through the padding path.
    q1s, q2s = critic_forward(state[:8], action[:8], packed,
                              compute_dtype=jnp.float32)
    jax.block_until_ready((q1s, q2s))
    assert jnp.allclose(q1s, q1_ref[:8], atol=1e-4, rtol=1e-4)
    assert jnp.allclose(q2s, q2_ref[:8], atol=1e-4, rtol=1e-4)

    print("KERNEL_OK")
</pallas_src>

<mosaic_0001>
module attributes {stable_mosaic.version = 11 : i64} {
  func.func @_critic_kernel(%arg0: i32, %arg1: memref<26x256xf32, #tpu.memory_space<vmem>>, %arg2: memref<256x24xf32, #tpu.memory_space<vmem>>, %arg3: memref<256x1xf32, #tpu.memory_space<vmem>>, %arg4: memref<256x256xf32, #tpu.memory_space<vmem>>, %arg5: memref<256x2xf32, #tpu.memory_space<vmem>>, %arg6: memref<256x1xf32, #tpu.memory_space<vmem>>, %arg7: memref<2x256xf32, #tpu.memory_space<vmem>>, %arg8: memref<2x1xf32, #tpu.memory_space<vmem>>, %arg9: memref<2x256xf32, #tpu.memory_space<vmem>>) attributes {dimension_semantics = [#tpu.dimension_semantics<parallel>], iteration_bounds = array<i64: 1>, scalar_prefetch = 0 : i64, scratch_operands = 0 : i64, tpu.core_type = #tpu.core_type<tc>, window_params = [{transform_indices = @transform_0, window_bounds = array<i64: 26, 256>}, {pipeline_mode = #tpu.pipeline_mode<synchronous>, transform_indices = @transform_1, window_bounds = array<i64: 256, 24>}, {pipeline_mode = #tpu.pipeline_mode<synchronous>, transform_indices = @transform_2, window_bounds = array<i64: 256, 1>}, {pipeline_mode = #tpu.pipeline_mode<synchronous>, transform_indices = @transform_3, window_bounds = array<i64: 256, 256>}, {pipeline_mode = #tpu.pipeline_mode<synchronous>, transform_indices = @transform_4, window_bounds = array<i64: 256, 2>}, {pipeline_mode = #tpu.pipeline_mode<synchronous>, transform_indices = @transform_5, window_bounds = array<i64: 256, 1>}, {pipeline_mode = #tpu.pipeline_mode<synchronous>, transform_indices = @transform_6, window_bounds = array<i64: 2, 256>}, {pipeline_mode = #tpu.pipeline_mode<synchronous>, transform_indices = @transform_7, window_bounds = array<i64: 2, 1>}, {transform_indices = @transform_8, window_bounds = array<i64: 2, 256>}]} {
    %c0 = arith.constant 0 : index
    %c0_0 = arith.constant 0 : index
    %0 = vector.load %arg1[%c0, %c0_0] : memref<26x256xf32, #tpu.memory_space<vmem>>, vector<26x256xf32>
    %1 = vector.extract_strided_slice %0 {offsets = [0, 0], sizes = [24, 256], strides = [1, 1]} : vector<26x256xf32> to vector<24x256xf32>
    %2 = vector.extract_strided_slice %0 {offsets = [24, 0], sizes = [2, 256], strides = [1, 1]} : vector<26x256xf32> to vector<2x256xf32>
    %c0_1 = arith.constant 0 : index
    %c0_2 = arith.constant 0 : index
    %3 = vector.load %arg2[%c0_1, %c0_2] : memref<256x24xf32, #tpu.memory_space<vmem>>, vector<256x24xf32>
    %cst = arith.constant dense<0.000000e+00> : vector<256x256xf32>
    %4 = tpu.matmul %3, %1, %cst {dimension_numbers = #tpu.dot_dimension_numbers<[1], [0], [0], [1], [0, 0, 1, 1], [], []>} : vector<256x24xf32>, vector<24x256xf32>, vector<256x256xf32> -> vector<256x256xf32>
    %c0_3 = arith.constant 0 : index
    %c0_4 = arith.constant 0 : index
    %5 = vector.load %arg3[%c0_3, %c0_4] : memref<256x1xf32, #tpu.memory_space<vmem>>, vector<256x1xf32>
    %6 = vector.broadcast %5 : vector<256x1xf32> to vector<256x256xf32>
    %7 = arith.addf %4, %6 : vector<256x256xf32>
    %cst_5 = arith.constant 0.000000e+00 : f32
    %8 = vector.broadcast %cst_5 : f32 to vector<256x256xf32>
    %9 = arith.maximumf %7, %8 : vector<256x256xf32>
    %c0_6 = arith.constant 0 : index
    %c0_7 = arith.constant 0 : index
    %10 = vector.load %arg4[%c0_6, %c0_7] : memref<256x256xf32, #tpu.memory_space<vmem>>, vector<256x256xf32>
    %cst_8 = arith.constant dense<0.000000e+00> : vector<256x256xf32>
    %11 = tpu.matmul %10, %9, %cst_8 {dimension_numbers = #tpu.dot_dimension_numbers<[1], [0], [0], [1], [0, 0, 1, 1], [], []>} : vector<256x256xf32>, vector<256x256xf32>, vector<256x256xf32> -> vector<256x256xf32>
    %c0_9 = arith.constant 0 : index
    %c0_10 = arith.constant 0 : index
    %12 = vector.load %arg5[%c0_9, %c0_10] : memref<256x2xf32, #tpu.memory_space<vmem>>, vector<256x2xf32>
    %cst_11 = arith.constant dense<0.000000e+00> : vector<256x256xf32>
    %13 = tpu.matmul %12, %2, %cst_11 {dimension_numbers = #tpu.dot_dimension_numbers<[1], [0], [0], [1], [0, 0, 1, 1], [], []>} : vector<256x2xf32>, vector<2x256xf32>, vector<256x256xf32> -> vector<256x256xf32>
    %14 = arith.addf %11, %13 : vector<256x256xf32>
    %c0_12 = arith.constant 0 : index
    %c0_13 = arith.constant 0 : index
    %15 = vector.load %arg6[%c0_12, %c0_13] : memref<256x1xf32, #tpu.memory_space<vmem>>, vector<256x1xf32>
    %16 = vector.broadcast %15 : vector<256x1xf32> to vector<256x256xf32>
    %17 = arith.addf %14, %16 : vector<256x256xf32>
    %cst_14 = arith.constant 0.000000e+00 : f32
    %18 = vector.broadcast %cst_14 : f32 to vector<256x256xf32>
    %19 = arith.maximumf %17, %18 : vector<256x256xf32>
    %c0_15 = arith.constant 0 : index
    %c0_16 = arith.constant 0 : index
    %20 = vector.load %arg7[%c0_15, %c0_16] : memref<2x256xf32, #tpu.memory_space<vmem>>, vector<2x256xf32>
    %cst_17 = arith.constant dense<0.000000e+00> : vector<2x256xf32>
    %21 = tpu.matmul %20, %19, %cst_17 {dimension_numbers = #tpu.dot_dimension_numbers<[1], [0], [0], [1], [0, 0, 1, 1], [], []>} : vector<2x256xf32>, vector<256x256xf32>, vector<2x256xf32> -> vector<2x256xf32>
    %c0_18 = arith.constant 0 : index
    %c0_19 = arith.constant 0 : index
    %22 = vector.load %arg8[%c0_18, %c0_19] : memref<2x1xf32, #tpu.memory_space<vmem>>, vector<2x1xf32>
    %23 = vector.broadcast %22 : vector<2x1xf32> to vector<2x256xf32>
    %24 = arith.addf %21, %23 : vector<2x256xf32>
    %c0_20 = arith.constant 0 : index
    %c0_21 = arith.constant 0 : index
    %25 = vector.load %arg9[%c0_20, %c0_21] : memref<2x256xf32, #tpu.memory_space<vmem>>, vector<2x256xf32>
    tpu.vector_store %arg9[%c0_20, %c0_21], %24 {strides = array<i32>} : memref<2x256xf32, #tpu.memory_space<vmem>>, vector<2x256xf32>,
    return
  }
  func.func @transform_0(%arg0: i32) -> (i32, i32) {
    %c0_i32 = arith.constant 0 : i32
    %c0_i32_0 = arith.constant 0 : i32
    return %c0_i32, %arg0 : i32, i32
  }
  func.func @transform_1(%arg0: i32) -> (i32, i32) {
    %c0_i32 = arith.constant 0 : i32
    %c0_i32_0 = arith.constant 0 : i32
    %c0_i32_1 = arith.constant 0 : i32
    return %c0_i32, %c0_i32_0 : i32, i32
  }
  func.func @transform_2(%arg0: i32) -> (i32, i32) {
    %c0_i32 = arith.constant 0 : i32
    %c0_i32_0 = arith.constant 0 : i32
    %c0_i32_1 = arith.constant 0 : i32
    return %c0_i32, %c0_i32_0 : i32, i32
  }
  func.func @transform_3(%arg0: i32) -> (i32, i32) {
    %c0_i32 = arith.constant 0 : i32
    %c0_i32_0 = arith.constant 0 : i32
    %c0_i32_1 = arith.constant 0 : i32
    return %c0_i32, %c0_i32_0 : i32, i32
  }
  func.func @transform_4(%arg0: i32) -> (i32, i32) {
    %c0_i32 = arith.constant 0 : i32
    %c0_i32_0 = arith.constant 0 : i32
    %c0_i32_1 = arith.constant 0 : i32
    return %c0_i32, %c0_i32_0 : i32, i32
  }
  func.func @transform_5(%arg0: i32) -> (i32, i32) {
    %c0_i32 = arith.constant 0 : i32
    %c0_i32_0 = arith.constant 0 : i32
    %c0_i32_1 = arith.constant 0 : i32
    return %c0_i32, %c0_i32_0 : i32, i32
  }
  func.func @transform_6(%arg0: i32) -> (i32, i32) {
    %c0_i32 = arith.constant 0 : i32
    %c0_i32_0 = arith.constant 0 : i32
    %c0_i32_1 = arith.constant 0 : i32
    return %c0_i32, %c0_i32_0 : i32, i32
  }
  func.func @transform_7(%arg0: i32) -> (i32, i32) {
    %c0_i32 = arith.constant 0 : i32
    %c0_i32_0 = arith.constant 0 : i32
    %c0_i32_1 = arith.constant 0 : i32
    return %c0_i32, %c0_i32_0 : i32, i32
  }
  func.func @transform_8(%arg0: i32) -> (i32, i32) {
    %c0_i32 = arith.constant 0 : i32
    %c0_i32_0 = arith.constant 0 : i32
    return %c0_i32, %arg0 : i32, i32
  }
}

</mosaic_0001>

<bundles_post_ra>
// kernel: critic_forward.1
= control target key start
LH: loop header
LB: loop body
LE: loop exit
PB: predicated region body
PF: predicated region fallthrough
CT: control target
= control target key end

     0   :  { %v2088_v3 = vmov 0.0   ;;  %v2089_v4 = vmov 0   ;;  %vm261_vm0 = vcmask 195584   ;;  %vm872_vm1 = vcmask 1041408   ;;  %s2977_s0 = inlined_call_operand.vmem [shape: f32[26,256], index: 0, kind: input, shape index: {}]   ;;  %s2978_s2 = inlined_call_operand.vmem [shape: f32[256,1], index: 2, kind: input, shape index: {}]   ;;  %s2979_s1 = inlined_call_operand.vmem [shape: f32[256,24], index: 1, kind: input, shape index: {}]   ;;  %s2980_s5 = inlined_call_operand.vmem [shape: f32[256,1], index: 5, kind: input, shape index: {}]   ;;  %s2981_s4 = inlined_call_operand.vmem [shape: f32[256,2], index: 4, kind: input, shape index: {}]   ;;  %s2982_s7 = inlined_call_operand.vmem [shape: f32[2,1], index: 7, kind: input, shape index: {}]   ;;  %s2983_s3 = inlined_call_operand.vmem [shape: f32[256,256], index: 3, kind: input, shape index: {}]   ;;  %s2984_s6 = inlined_call_operand.vmem [shape: f32[2,256], index: 6, kind: input, shape index: {}]   ;;  %s2985_s8 = inlined_call_operand.vmem [shape: f32[2,256], index: 8, kind: output, shape index: {}]  }
   0x1   :  { %v30_v0 = vld [vmem:[%s2977_s0 + $0x8] sm:$0xff]  ;;  %v32_v1 = vld [vmem:[%s2977_s0 + $0x18] sm:$0xff]  ;;  %v29_v2 = vld [vmem:[%s2977_s0] sm:$0xff]  ;;  %422 = vmatprep.mubr.f32.mxu0 %v2088_v3  ;;  %2086 = vset.pattern.permute.xlu0 %v2089_v4  ;;  %vm775_vm2 = vcmask 15360  }
   0x2   :  { %v1886_v5 = vpack.c.bf16 %v32_v1, %v30_v0  ;;  %v31_v6 = vld [vmem:[%s2977_s0 + $0x10] sm:$0xff]  ;;  %2087 = vset.pattern.permute.xlu1 %v2089_v4  ;;  %1039 = vmatprep.mubr.f32.mxu1 %v2088_v3  ;;  %v34_v8 = vld [vmem:[%s2977_s0 + $0x28] sm:$0xff]  ;;  %v69_v9 = vld [vmem:[%s2978_s2] sm:$0xff] }
   0x3   :  { %v1888_v7 = vpack.c.bf16 %v31_v6, %v29_v2  ;;  %103 = vperm.xlu0 %2086, %v69_v9   ;;  %v33_v10 = vld [vmem:[%s2977_s0 + $0x20] sm:$0xff]  ;;  %v70_v11 = vld [vmem:[%s2978_s2 + $0x8] sm:$0xff]  ;;  %v71_v12 = vld [vmem:[%s2978_s2 + $0x10] sm:$0xff] }
   0x4   :  { %1887 = vmatprep.subr.bf16.mxu0 %v1886_v5  ;;  %v37_v13 = vld [vmem:[%s2979_s1] sm:$0xff]  ;;  %113 = vperm.xlu1 %2087, %v71_v12   ;;  %v72_v14 = vld [vmem:[%s2978_s2 + $0x18] sm:$0xff]  ;;  %v38_v16 = vld [vmem:[%s2979_s1 + $0x8] sm:$0xff] }
   0x5   :  { %1889 = vmatpush1.bf16.msra.mxu0 %v1888_v7  ;;  %v73_v15 = vld [vmem:[%s2978_s2 + $0x20] sm:$0xff]  ;;  %v74_v17 = vld [vmem:[%s2978_s2 + $0x28] sm:$0xff]  ;;  %v75_v18 = vld [vmem:[%s2978_s2 + $0x30] sm:$0xff] }
   0x6   :  { %362 = vmatprep.subr.mxu0 %v34_v8  ;;  %v39_v19 = vld [vmem:[%s2979_s1 + $0x10] sm:$0xff]  ;;  %v76_v20 = vld [vmem:[%s2978_s2 + $0x38] sm:$0xff]  ;;  %v77_v21 = vld [vmem:[%s2978_s2 + $0x40] sm:$0xff] }
   0x7   :  { %108 = vperm.xlu0 %2086, %v70_v11   ;;  %v40_v22 = vld [vmem:[%s2979_s1 + $0x18] sm:$0xff]  ;;  %v78_v23 = vld [vmem:[%s2978_s2 + $0x48] sm:$0xff]  ;;  %v79_v24 = vld [vmem:[%s2978_s2 + $0x50] sm:$0xff] }
   0x8   :  { %118 = vperm.xlu1 %2087, %v72_v14   ;;  %v41_v25 = vld [vmem:[%s2979_s1 + $0x20] sm:$0xff]  ;;  %v80_v26 = vld [vmem:[%s2978_s2 + $0x58] sm:$0xff]  ;;  %v42_v28 = vld [vmem:[%s2979_s1 + $0x28] sm:$0xff] }
   0x9   :  { %363 = vmatpush1.msra.mxu0 %v33_v10  ;;  %v81_v27 = vld [vmem:[%s2978_s2 + $0x60] sm:$0xff]  ;;  %v82_v29 = vld [vmem:[%s2978_s2 + $0x68] sm:$0xff]  ;;  %v83_v30 = vld [vmem:[%s2978_s2 + $0x70] sm:$0xff] }
   0xa   :  { %1818 = vmatmul.mubr.msk.f32.vlgmr.msra.gmra.mrb[0].mxu0 %vm261_vm0, %v37_v13  ;;  %v43_v31 = vld [vmem:[%s2979_s1 + $0x30] sm:$0xff]  ;;  %v84_v32 = vld [vmem:[%s2978_s2 + $0x78] sm:$0xff]  ;;  %v85_v33 = vld [vmem:[%s2978_s2 + $0x80] sm:$0xff] }
   0xb   :  { %428 = vmatprep.mubr.f32.mxu0 %v2088_v3  ;;  %123 = vperm.xlu0 %2086, %v73_v15   ;;  %v44_v34 = vld [vmem:[%s2979_s1 + $0x38] sm:$0xff]  ;;  %v86_v35 = vld [vmem:[%s2978_s2 + $0x88] sm:$0xff]  ;;  %v87_v36 = vld [vmem:[%s2978_s2 + $0x90] sm:$0xff] }
   0xc   :  { %128 = vperm.xlu1 %2087, %v74_v17   ;;  %v45_v37 = vld [vmem:[%s2979_s1 + $0x40] sm:$0xff]  ;;  %v88_v38 = vld [vmem:[%s2978_s2 + $0x98] sm:$0xff]  ;;  %v46_v40 = vld [vmem:[%s2979_s1 + $0x48] sm:$0xff] }
   0xd   :  { %v89_v39 = vld [vmem:[%s2978_s2 + $0xa0] sm:$0xff]  ;;  %v90_v41 = vld [vmem:[%s2978_s2 + $0xa8] sm:$0xff]  ;;  %v91_v42 = vld [vmem:[%s2978_s2 + $0xb0] sm:$0xff] }
   0xe   :  { %1819 = vmatmul.mubr.msk.f32.gmra.mrb[2].mxu0 %vm261_vm0, %v38_v16  ;;  %v47_v43 = vld [vmem:[%s2979_s1 + $0x50] sm:$0xff]  ;;  %v92_v44 = vld [vmem:[%s2978_s2 + $0xb8] sm:$0xff]  ;;  %v93_v45 = vld [vmem:[%s2978_s2 + $0xc0] sm:$0xff] }
   0xf   :  { %434 = vmatprep.mubr.f32.mxu0 %v2088_v3  ;;  %133 = vperm.xlu0 %2086, %v75_v18   ;;  %v48_v46 = vld [vmem:[%s2979_s1 + $0x58] sm:$0xff]  ;;  %v94_v47 = vld [vmem:[%s2978_s2 + $0xc8] sm:$0xff]  ;;  %v95_v48 = vld [vmem:[%s2978_s2 + $0xd0] sm:$0xff] }
  0x10   :  { %138 = vperm.xlu1 %2087, %v76_v20   ;;  %v49_v49 = vld [vmem:[%s2979_s1 + $0x60] sm:$0xff]  ;;  %v96_v50 = vld [vmem:[%s2978_s2 + $0xd8] sm:$0xff]  ;;  %v50_v52 = vld [vmem:[%s2979_s1 + $0x68] sm:$0xff] }
  0x11   :  { %v97_v51 = vld [vmem:[%s2978_s2 + $0xe0] sm:$0xff]  ;;  %v98_v53 = vld [vmem:[%s2978_s2 + $0xe8] sm:$0xff]  ;;  %v99_v54 = vld [vmem:[%s2978_s2 + $0xf0] sm:$0xff] }
  0x12   :  { %1820 = vmatmul.mubr.msk.f32.gmra.mrb[4].mxu0 %vm261_vm0, %v39_v19  ;;  %v51_v55 = vld [vmem:[%s2979_s1 + $0x70] sm:$0xff]  ;;  %v100_v56 = vld [vmem:[%s2978_s2 + $0xf8] sm:$0xff]  ;;  %v1393_v57 = vld [vmem:[%s2980_s5] sm:$0xff] }
  0x13   :  { %440 = vmatprep.mubr.f32.mxu0 %v2088_v3  ;;  %143 = vperm.xlu0 %2086, %v77_v21   ;;  %v52_v58 = vld [vmem:[%s2979_s1 + $0x78] sm:$0xff]  ;;  %v1394_v59 = vld [vmem:[%s2980_s5 + $0x8] sm:$0xff]  ;;  %v1395_v60 = vld [vmem:[%s2980_s5 + $0x10] sm:$0xff] }
  0x14   :  { %148 = vperm.xlu1 %2087, %v78_v23   ;;  %v53_v61 = vld [vmem:[%s2979_s1 + $0x80] sm:$0xff]  ;;  %v1396_v62 = vld [vmem:[%s2980_s5 + $0x18] sm:$0xff]  ;;  %v54_v0 = vld [vmem:[%s2979_s1 + $0x88] sm:$0xff] }
  0x15   :  { %v1397_v63 = vld [vmem:[%s2980_s5 + $0x20] sm:$0xff]  ;;  %v1398_v1 = vld [vmem:[%s2980_s5 + $0x28] sm:$0xff]  ;;  %v1399_v2 = vld [vmem:[%s2980_s5 + $0x30] sm:$0xff] }
  0x16   :  { %1821 = vmatmul.mubr.msk.f32.gmra.mrb[6].mxu0 %vm261_vm0, %v40_v22  ;;  %v55_v4 = vld [vmem:[%s2979_s1 + $0x90] sm:$0xff]  ;;  %v1400_v5 = vld [vmem:[%s2980_s5 + $0x38] sm:$0xff]  ;;  %v1401_v6 = vld [vmem:[%s2980_s5 + $0x40] sm:$0xff] }
  0x17   :  { %446 = vmatprep.mubr.f32.mxu0 %v2088_v3  ;;  %153 = vperm.xlu0 %2086, %v79_v24   ;;  %v56_v7 = vld [vmem:[%s2979_s1 + $0x98] sm:$0xff]  ;;  %v1402_v8 = vld [vmem:[%s2980_s5 + $0x48] sm:$0xff]  ;;  %v1403_v9 = vld [vmem:[%s2980_s5 + $0x50] sm:$0xff] }
  0x18   :  { %158 = vperm.xlu1 %2087, %v80_v26   ;;  %v57_v10 = vld [vmem:[%s2979_s1 + $0xa0] sm:$0xff]  ;;  %v1404_v11 = vld [vmem:[%s2980_s5 + $0x58] sm:$0xff]  ;;  %v58_v13 = vld [vmem:[%s2979_s1 + $0xa8] sm:$0xff] }
  0x19   :  { %v1405_v12 = vld [vmem:[%s2980_s5 + $0x60] sm:$0xff]  ;;  %v1406_v14 = vld [vmem:[%s2980_s5 + $0x68] sm:$0xff]  ;;  %v1407_v15 = vld [vmem:[%s2980_s5 + $0x70] sm:$0xff] }
  0x1a   :  { %1822 = vmatmul.mubr.msk.f32.gmra.mrb[8].mxu0 %vm261_vm0, %v41_v25  ;;  %v59_v16 = vld [vmem:[%s2979_s1 + $0xb0] sm:$0xff]  ;;  %v1408_v17 = vld [vmem:[%s2980_s5 + $0x78] sm:$0xff]  ;;  %v1409_v18 = vld [vmem:[%s2980_s5 + $0x80] sm:$0xff] }
  0x1b   :  { %452 = vmatprep.mubr.f32.mxu0 %v2088_v3  ;;  %163 = vperm.xlu0 %2086, %v81_v27   ;;  %v60_v19 = vld [vmem:[%s2979_s1 + $0xb8] sm:$0xff]  ;;  %v1410_v20 = vld [vmem:[%s2980_s5 + $0x88] sm:$0xff]  ;;  %v1411_v21 = vld [vmem:[%s2980_s5 + $0x90] sm:$0xff] }
  0x1c   :  { %168 = vperm.xlu1 %2087, %v82_v29   ;;  %v36_v22 = vld [vmem:[%s2977_s0 + $0x38] sm:$0x3]  ;;  %v61_v23 = vld [vmem:[%s2979_s1 + $0xc0] sm:$0xff]  ;;  %v35_v24 = vld [vmem:[%s2977_s0 + $0x30] sm:$0x3] }
  0x1d   :  { %v1412_v25 = vld [vmem:[%s2980_s5 + $0x98] sm:$0xff]  ;;  %2018 = vmatprep.subr.msk.mxu1 %vm872_vm1, %v36_v22  ;;  %1850 = vmatprep.subr.msk.mxu0 %vm872_vm1, %v36_v22  ;;  %v759_v26 = vld [vmem:[%s2981_s4 + $0x80] sm:$0xff]  ;;  %v1414_v29 = vld [vmem:[%s2980_s5 + $0xa8] sm:$0xff] }
  0x1e   :  { %1823 = vmatmul.mubr.msk.f32.gmra.mrb[10].mxu0 %vm261_vm0, %v42_v28  ;;  %2019 = vmatpush1.msk.msra.mxu1 %vm872_vm1, %v35_v24  ;;  %v1413_v27 = vld [vmem:[%s2980_s5 + $0xa0] sm:$0xff]  ;;  %v62_v28 = vld [vmem:[%s2979_s1 + $0xc8] sm:$0xff] }
  0x1f   :  { %458 = vmatprep.mubr.f32.mxu0 %v2088_v3  ;;  %173 = vperm.xlu0 %2086, %v83_v30   ;;  %v1415_v30 = vld [vmem:[%s2980_s5 + $0xb0] sm:$0xff] }
  0x20   :  { %178 = vperm.xlu1 %2087, %v84_v32   ;;  %1868 = vmatmul.mubr.msk.f32.vlgmr.msra.gmra.mrb[0].mxu1 %vm775_vm2, %v759_v26  ;;  %v1416_v32 = vld [vmem:[%s2980_s5 + $0xb8] sm:$0xff] }
  0x21   :  { %1851 = vmatpush1.msk.msra.mxu0 %vm872_vm1, %v35_v24  ;;  %1045 = vmatprep.mubr.f32.mxu1 %v2088_v3 }
  0x22   :  { %1824 = vmatmul.mubr.msk.f32.gmra.mrb[12].mxu0 %vm261_vm0, %v43_v31  ;;  %v63_v31 = vld [vmem:[%s2979_s1 + $0xd0] sm:$0xff] }
  0x23   :  { %464 = vmatprep.mubr.f32.mxu0 %v2088_v3  ;;  %183 = vperm.xlu0 %2086, %v85_v33   ;;  %v1417_v33 = vld [vmem:[%s2980_s5 + $0xc0] sm:$0xff] }
  0x24   :  { %188 = vperm.xlu1 %2087, %v86_v35   ;;  %v1418_v35 = vld [vmem:[%s2980_s5 + $0xc8] sm:$0xff] }
  0x26   :  { %1825 = vmatmul.mubr.msk.f32.gmra.mrb[14].mxu0 %vm261_vm0, %v44_v34  ;;  %v64_v34 = vld [vmem:[%s2979_s1 + $0xd8] sm:$0xff] }
  0x27   :  { %470 = vmatprep.mubr.f32.mxu0 %v2088_v3  ;;  %193 = vperm.xlu0 %2086, %v87_v36   ;;  %v1419_v36 = vld [vmem:[%s2980_s5 + $0xd0] sm:$0xff] }
  0x28   :  { %198 = vperm.xlu1 %2087, %v88_v38   ;;  %v1420_v38 = vld [vmem:[%s2980_s5 + $0xd8] sm:$0xff] }
  0x2a   :  { %1826 = vmatmul.mubr.msk.f32.gmra.mrb[16].mxu0 %vm261_vm0, %v45_v37  ;;  %v65_v37 = vld [vmem:[%s2979_s1 + $0xe0] sm:$0xff] }
  0x2b   :  { %476 = vmatprep.mubr.f32.mxu0 %v2088_v3  ;;  %203 = vperm.xlu0 %2086, %v89_v39   ;;  %v1421_v39 = vld [vmem:[%s2980_s5 + $0xe0] sm:$0xff] }
  0x2c   :  { %208 = vperm.xlu1 %2087, %v90_v41   ;;  %v1422_v41 = vld [vmem:[%s2980_s5 + $0xe8] sm:$0xff] }
  0x2e   :  { %1827 = vmatmul.mubr.msk.f32.gmra.mrb[18].mxu0 %vm261_vm0, %v46_v40  ;;  %v66_v40 = vld [vmem:[%s2979_s1 + $0xe8] sm:$0xff] }
  0x2f   :  { %482 = vmatprep.mubr.f32.mxu0 %v2088_v3  ;;  %213 = vperm.xlu0 %2086, %v91_v42   ;;  %v1423_v42 = vld [vmem:[%s2980_s5 + $0xf0] sm:$0xff] }
  0x30   :  { %218 = vperm.xlu1 %2087, %v92_v44   ;;  %v1424_v44 = vld [vmem:[%s2980_s5 + $0xf8] sm:$0xff] }
  0x32   :  { %1828 = vmatmul.mubr.msk.f32.gmra.mrb[20].mxu0 %vm261_vm0, %v47_v43  ;;  %v67_v43 = vld [vmem:[%s2979_s1 + $0xf0] sm:$0xff] }
  0x33   :  { %488 = vmatprep.mubr.f32.mxu0 %v2088_v3  ;;  %223 = vperm.xlu0 %2086, %v93_v45   ;;  %v1714_v45 = vld [vmem:[%s2982_s7] sm:$0x3] }
  0x34   :  { %228 = vperm.xlu1 %2087, %v94_v47   ;;  %v760_v47 = vld [vmem:[%s2981_s4 + $0x88] sm:$0xff] }
  0x35   :  { %1869 = vmatmul.mubr.msk.f32.gmra.mrb[2].mxu1 %vm775_vm2, %v760_v47 }
  0x36   :  { %1829 = vmatmul.mubr.msk.f32.gmra.mrb[22].mxu0 %vm261_vm0, %v48_v46  ;;  %v68_v46 = vld [vmem:[%s2979_s1 + $0xf8] sm:$0xff]  ;;  %1051 = vmatprep.mubr.f32.mxu1 %v2088_v3 }
  0x37   :  { %494 = vmatprep.mubr.f32.mxu0 %v2088_v3  ;;  %233 = vperm.xlu0 %2086, %v95_v48   ;;  %v761_v48 = vld [vmem:[%s2981_s4 + $0x90] sm:$0xff] }
  0x38   :  { %238 = vperm.xlu1 %2087, %v96_v50   ;;  %v763_v50 = vld [vmem:[%s2981_s4 + $0xa0] sm:$0xff] }
  0x39   :  { %1870 = vmatmul.mubr.msk.f32.gmra.mrb[4].mxu1 %vm775_vm2, %v761_v48 }
  0x3a   :  { %1830 = vmatmul.mubr.msk.f32.gmra.mrb[24].mxu0 %vm261_vm0, %v49_v49  ;;  %1057 = vmatprep.mubr.f32.mxu1 %v2088_v3  ;;  %v762_v49 = vld [vmem:[%s2981_s4 + $0x98] sm:$0xff] }
  0x3b   :  { %500 = vmatprep.mubr.f32.mxu0 %v2088_v3  ;;  %243 = vperm.xlu0 %2086, %v97_v51   ;;  %v764_v51 = vld [vmem:[%s2981_s4 + $0xa8] sm:$0xff] }
  0x3c   :  { %248 = vperm.xlu1 %2087, %v98_v53   ;;  %v766_v53 = vld [vmem:[%s2981_s4 + $0xb8] sm:$0xff] }
  0x3d   :  { %1871 = vmatmul.mubr.msk.f32.gmra.mrb[6].mxu1 %vm775_vm2, %v762_v49 }
  0x3e   :  { %1831 = vmatmul.mubr.msk.f32.gmra.mrb[26].mxu0 %vm261_vm0, %v50_v52  ;;  %1063 = vmatprep.mubr.f32.mxu1 %v2088_v3  ;;  %v765_v52 = vld [vmem:[%s2981_s4 + $0xb0] sm:$0xff] }
  0x3f   :  { %506 = vmatprep.mubr.f32.mxu0 %v2088_v3  ;;  %253 = vperm.xlu0 %2086, %v99_v54   ;;  %v767_v54 = vld [vmem:[%s2981_s4 + $0xc0] sm:$0xff] }
  0x40   :  { %258 = vperm.xlu1 %2087, %v100_v56   ;;  %v769_v56 = vld [vmem:[%s2981_s4 + $0xd0] sm:$0xff] }
  0x41   :  { %1872 = vmatmul.mubr.msk.f32.gmra.mrb[8].mxu1 %vm775_vm2, %v763_v50 }
  0x42   :  { %1832 = vmatmul.mubr.msk.f32.gmra.mrb[28].mxu0 %vm261_vm0, %v51_v55  ;;  %1069 = vmatprep.mubr.f32.mxu1 %v2088_v3  ;;  %v768_v55 = vld [vmem:[%s2981_s4 + $0xc8] sm:$0xff] }
  0x43   :  { %512 = vmatprep.mubr.f32.mxu0 %v2088_v3  ;;  %1427 = vperm.xlu0 %2086, %v1393_v57   ;;  %v770_v57 = vld [vmem:[%s2981_s4 + $0xd8] sm:$0xff] }
  0x44   :  { %1432 = vperm.xlu1 %2087, %v1394_v59   ;;  %v772_v59 = vld [vmem:[%s2981_s4 + $0xe8] sm:$0xff] }
  0x45   :  { %1873 = vmatmul.mubr.msk.f32.gmra.mrb[10].mxu1 %vm775_vm2, %v764_v51 }
  0x46   :  { %1833 = vmatmul.mubr.msk.f32.gmra.mrb[30].mxu0 %vm261_vm0, %v52_v58  ;;  %1075 = vmatprep.mubr.f32.mxu1 %v2088_v3  ;;  %v771_v58 = vld [vmem:[%s2981_s4 + $0xe0] sm:$0xff] }
  0x47   :  { %518 = vmatprep.mubr.f32.mxu0 %v2088_v3  ;;  %1437 = vperm.xlu0 %2086, %v1395_v60  }
  0x48   :  { %1442 = vperm.xlu1 %2087, %v1396_v62  }
  0x49   :  { %1874 = vmatmul.mubr.msk.f32.gmra.mrb[12].mxu1 %vm775_vm2, %v765_v52  ;;  %v748_v52 = vld [vmem:[%s2981_s4 + $0x28] sm:$0xff] }
  0x4a   :  { %1834 = vmatmul.mubr.msk.f32.gmra.mrb[32].mxu0 %vm261_vm0, %v53_v61  ;;  %1081 = vmatprep.mubr.f32.mxu1 %v2088_v3  ;;  %v773_v61 = vld [vmem:[%s2981_s4 + $0xf0] sm:$0xff] }
  0x4b   :  { %524 = vmatprep.mubr.f32.mxu0 %v2088_v3  ;;  %1447 = vperm.xlu0 %2086, %v1397_v63  }
  0x4c   :  { %1452 = vperm.xlu1 %2087, %v1398_v1  }
  0x4d   :  { %1875 = vmatmul.mubr.msk.f32.gmra.mrb[14].mxu1 %vm775_vm2, %v766_v53 }
  0x4e   :  { %1835 = vmatmul.mubr.msk.f32.gmra.mrb[34].mxu0 %vm261_vm0, %v54_v0  ;;  %1087 = vmatprep.mubr.f32.mxu1 %v2088_v3  ;;  %v774_v0 = vld [vmem:[%s2981_s4 + $0xf8] sm:$0xff] }
  0x4f   :  { %530 = vmatprep.mubr.f32.mxu0 %v2088_v3  ;;  %1457 = vperm.xlu0 %2086, %v1399_v2  }
  0x50   :  { %1462 = vperm.xlu1 %2087, %v1400_v5  }
  0x51   :  { %1876 = vmatmul.mubr.msk.f32.gmra.mrb[16].mxu1 %vm775_vm2, %v767_v54 }
  0x52   :  { %1836 = vmatmul.mubr.msk.f32.gmra.mrb[36].mxu0 %vm261_vm0, %v55_v4  ;;  %1093 = vmatprep.mubr.f32.mxu1 %v2088_v3 }
  0x53   :  { %536 = vmatprep.mubr.f32.mxu0 %v2088_v3  ;;  %1467 = vperm.xlu0 %2086, %v1401_v6  }
  0x54   :  { %1472 = vperm.xlu1 %2087, %v1402_v8   ;;  %v743_v8 = vld [vmem:[%s2981_s4] sm:$0xff] }
  0x55   :  { %1877 = vmatmul.mubr.msk.f32.gmra.mrb[18].mxu1 %vm775_vm2, %v768_v55 }
  0x56   :  { %1837 = vmatmul.mubr.msk.f32.gmra.mrb[38].mxu0 %vm261_vm0, %v56_v7  ;;  %1099 = vmatprep.mubr.f32.mxu1 %v2088_v3 }
  0x57   :  { %542 = vmatprep.mubr.f32.mxu0 %v2088_v3  ;;  %1477 = vperm.xlu0 %2086, %v1403_v9  }
  0x58   :  { %1482 = vperm.xlu1 %2087, %v1404_v11   ;;  %v680_v11 = vld [vmem:[%s2983_s3 + $0x8] sm:$0xff] }
  0x59   :  { %1878 = vmatmul.mubr.msk.f32.gmra.mrb[20].mxu1 %vm775_vm2, %v769_v56 }
  0x5a   :  { %1838 = vmatmul.mubr.msk.f32.gmra.mrb[40].mxu0 %vm261_vm0, %v57_v10  ;;  %1105 = vmatprep.mubr.f32.mxu1 %v2088_v3 }
  0x5b   :  { %548 = vmatprep.mubr.f32.mxu0 %v2088_v3  ;;  %1487 = vperm.xlu0 %2086, %v1405_v12  }
  0x5c   :  { %1492 = vperm.xlu1 %2087, %v1406_v14  }
  0x5d   :  { %1879 = vmatmul.mubr.msk.f32.gmra.mrb[22].mxu1 %vm775_vm2, %v770_v57 }
  0x5e   :  { %1839 = vmatmul.mubr.msk.f32.gmra.mrb[42].mxu0 %vm261_vm0, %v58_v13  ;;  %1111 = vmatprep.mubr.f32.mxu1 %v2088_v3 }
  0x5f   :  { %554 = vmatprep.mubr.f32.mxu0 %v2088_v3  ;;  %1497 = vperm.xlu0 %2086, %v1407_v15  }
  0x60   :  { %1502 = vperm.xlu1 %2087, %v1408_v17   ;;  %v744_v17 = vld [vmem:[%s2981_s4 + $0x8] sm:$0xff] }
  0x61   :  { %1880 = vmatmul.mubr.msk.f32.gmra.mrb[24].mxu1 %vm775_vm2, %v771_v58 }
  0x62   :  { %1840 = vmatmul.mubr.msk.f32.gmra.mrb[44].mxu0 %vm261_vm0, %v59_v16  ;;  %1117 = vmatprep.mubr.f32.mxu1 %v2088_v3 }
  0x63   :  { %560 = vmatprep.mubr.f32.mxu0 %v2088_v3  ;;  %1507 = vperm.xlu0 %2086, %v1409_v18  }
  0x64   :  { %1512 = vperm.xlu1 %2087, %v1410_v20  }
  0x65   :  { %1881 = vmatmul.mubr.msk.f32.gmra.mrb[26].mxu1 %vm775_vm2, %v772_v59 }
  0x66   :  { %1841 = vmatmul.mubr.msk.f32.gmra.mrb[46].mxu0 %vm261_vm0, %v60_v19  ;;  %1123 = vmatprep.mubr.f32.mxu1 %v2088_v3 }
  0x67   :  { %566 = vmatprep.mubr.f32.mxu0 %v2088_v3  ;;  %1517 = vperm.xlu0 %2086, %v1411_v21  }
  0x68   :  { %1522 = vperm.xlu1 %2087, %v1412_v25   ;;  %v745_v25 = vld [vmem:[%s2981_s4 + $0x10] sm:$0xff] }
  0x69   :  { %1882 = vmatmul.mubr.msk.f32.gmra.mrb[28].mxu1 %vm775_vm2, %v773_v61  ;;  %v749_v61 = vld [vmem:[%s2981_s4 + $0x30] sm:$0xff] }
  0x6a   :  { %1842 = vmatmul.mubr.msk.f32.gmra.mrb[48].mxu0 %vm261_vm0, %v61_v23  ;;  %1129 = vmatprep.mubr.f32.mxu1 %v2088_v3 }
  0x6b   :  { %572 = vmatprep.mubr.f32.mxu0 %v2088_v3  ;;  %1527 = vperm.xlu0 %2086, %v1413_v27  }
  0x6c   :  { %1532 = vperm.xlu1 %2087, %v1414_v29  }
  0x6d   :  { %1883 = vmatmul.mubr.msk.f32.gmra.mrb[30].mxu1 %vm775_vm2, %v774_v0 }
  0x6e   :  { %1843 = vmatmul.mubr.msk.f32.gmra.mrb[50].mxu0 %vm261_vm0, %v62_v28  ;;  %1200 = vmatprep.mubr.f32.mxu1 %v680_v11 }
  0x6f   :  { %578 = vmatprep.mubr.f32.mxu0 %v2088_v3  ;;  %1537 = vperm.xlu0 %2086, %v1415_v30  }
  0x70   :  { %1542 = vperm.xlu1 %2087, %v1416_v32  }
  0x72   :  { %1844 = vmatmul.mubr.msk.f32.gmra.mrb[52].mxu0 %vm261_vm0, %v63_v31 }
  0x73   :  { %584 = vmatprep.mubr.f32.mxu0 %v2088_v3  ;;  %1547 = vperm.xlu0 %2086, %v1417_v33  }
  0x74   :  { %1552 = vperm.xlu1 %2087, %v1418_v35  }
  0x76   :  { %1845 = vmatmul.mubr.msk.f32.gmra.mrb[54].mxu0 %vm261_vm0, %v64_v34  ;;  %v746_v34 = vld [vmem:[%s2981_s4 + $0x18] sm:$0xff] }
  0x77   :  { %590 = vmatprep.mubr.f32.mxu0 %v2088_v3  ;;  %1557 = vperm.xlu0 %2086, %v1419_v36  }
  0x78   :  { %1562 = vperm.xlu1 %2087, %v1420_v38  }
  0x7a   :  { %1846 = vmatmul.mubr.msk.f32.gmra.mrb[56].mxu0 %vm261_vm0, %v65_v37 }
  0x7b   :  { %596 = vmatprep.mubr.f32.mxu0 %v2088_v3  ;;  %1567 = vperm.xlu0 %2086, %v1421_v39  }
  0x7c   :  { %1572 = vperm.xlu1 %2087, %v1422_v41  }
  0x7e   :  { %1847 = vmatmul.mubr.msk.f32.gmra.mrb[58].mxu0 %vm261_vm0, %v66_v40 }
  0x7f   :  { %602 = vmatprep.mubr.f32.mxu0 %v2088_v3  ;;  %1577 = vperm.xlu0 %2086, %v1423_v42  }
  0x80   :  { %1582 = vperm.xlu1 %2087, %v1424_v44  }
  0x82   :  { %1848 = vmatmul.mubr.msk.f32.gmra.mrb[60].mxu0 %vm261_vm0, %v67_v43  ;;  %v104_v60 = vpop.permute.xlu0 %103  ;;  %v747_v43 = vld [vmem:[%s2981_s4 + $0x20] sm:$0xff] }
  0x83   :  { %608 = vmatprep.mubr.f32.mxu0 %v2088_v3  ;;  %1717 = vperm.xlu0 %2086, %v1714_v45   ;;  %v114_v9 = vpop.permute.xlu1 %113 }
  0x86   :  { %1849 = vmatmul.mubr.msk.f32.gmra.mrb[62].mxu0 %vm261_vm0, %v68_v46  ;;  %v109_v2 = vpop.permute.xlu0 %108 }
  0x87   :  { %943 = vmatprep.mubr.f32.mxu0 %v2088_v3  ;;  %v119_v22 = vpop.permute.xlu1 %118 }
  0x8a   :  { %1852 = vmatmul.mubr.msk.f32.vlgmr.msra.gmra.mrb[64].mxu0 %vm775_vm2, %v743_v8  ;;  %v124_v37 = vpop.permute.xlu0 %123 }
  0x8b   :  { %949 = vmatprep.mubr.f32.mxu0 %v2088_v3  ;;  %v129_v40 = vpop.permute.xlu1 %128 }
  0x8e   :  { %1853 = vmatmul.mubr.msk.f32.gmra.mrb[66].mxu0 %vm775_vm2, %v744_v17  ;;  %v134_v55 = vpop.permute.xlu0 %133 }
  0x8f   :  { %955 = vmatprep.mubr.f32.mxu0 %v2088_v3  ;;  %v139_v58 = vpop.permute.xlu1 %138 }
  0x92   :  { %1854 = vmatmul.mubr.msk.f32.gmra.mrb[68].mxu0 %vm775_vm2, %v745_v25  ;;  %v752_v25 = vld [vmem:[%s2981_s4 + $0x48] sm:$0xff] }
  0x93   :  { %961 = vmatprep.mubr.f32.mxu0 %v2088_v3 }
  0x96   :  { %1855 = vmatmul.mubr.msk.f32.gmra.mrb[70].mxu0 %vm775_vm2, %v746_v34  ;;  %v753_v34 = vld [vmem:[%s2981_s4 + $0x50] sm:$0xff] }
  0x97   :  { %967 = vmatprep.mubr.f32.mxu0 %v2088_v3 }
  0x9a   :  { %1856 = vmatmul.mubr.msk.f32.gmra.mrb[72].mxu0 %vm775_vm2, %v747_v43  ;;  %v754_v43 = vld [vmem:[%s2981_s4 + $0x58] sm:$0xff] }
  0x9b   :  { %973 = vmatprep.mubr.f32.mxu0 %v2088_v3 }
  0x9e   :  { %1857 = vmatmul.mubr.msk.f32.gmra.mrb[74].mxu0 %vm775_vm2, %v748_v52  ;;  %v755_v52 = vld [vmem:[%s2981_s4 + $0x60] sm:$0xff] }
  0x9f   :  { %979 = vmatprep.mubr.f32.mxu0 %v2088_v3 }
  0xa2   :  { %1858 = vmatmul.mubr.msk.f32.gmra.mrb[76].mxu0 %vm775_vm2, %v749_v61  ;;  %v756_v61 = vld [vmem:[%s2981_s4 + $0x68] sm:$0xff] }
  0xa3   :  { %985 = vmatprep.mubr.f32.mxu0 %v2088_v3 }
  0xdd   :  { %v424_v62 = vpop.f32.mrb[0].mxu0 }
  0xde   :  { %v426_v63 = vpop.f32.mrb[1].mxu0  ;;  %v425_v1 = vadd.f32 %v424_v62, %v104_v60 }
  0xdf   :  { %v427_v4 = vadd.f32 %v426_v63, %v104_v60 }
  0xe0   :  { %v615_v12 = vmax.f32 %v425_v1, 0.0 }
  0xe1   :  { %v430_v5 = vpop.f32.mrb[2].mxu0  ;;  %v616_v14 = vmax.f32 %v427_v4, 0.0 }
  0xe2   :  { %v431_v6 = vadd.f32 %v430_v5, %v109_v2  ;;  %v432_v7 = vpop.f32.mrb[3].mxu0 }
  0xe3   :  { %v433_v10 = vadd.f32 %v432_v7, %v109_v2  ;;  %v750_v7 = vld [vmem:[%s2981_s4 + $0x38] sm:$0xff] }
  0xe4   :  { %v617_v13 = vmax.f32 %v431_v6, 0.0  ;;  %1859 = vmatmul.mubr.msk.f32.gmra.mrb[78].mxu0 %vm775_vm2, %v750_v7  ;;  %v757_v7 = vld [vmem:[%s2981_s4 + $0x70] sm:$0xff] }
  0xe5   :  { %v618_v15 = vmax.f32 %v433_v10, 0.0  ;;  %v436_v16 = vpop.f32.mrb[4].mxu0  ;;  %v144_v10 = vpop.permute.xlu0 %143  ;;  %991 = vmatprep.mubr.f32.mxu0 %v2088_v3 }
  0xe6   :  { %v1892_v18 = vpack.c.bf16 %v617_v13, %v615_v12  ;;  %v438_v19 = vpop.f32.mrb[5].mxu0  ;;  %v437_v21 = vadd.f32 %v436_v16, %v114_v9  ;;  %v149_v13 = vpop.permute.xlu1 %148  ;;  %v751_v16 = vld [vmem:[%s2981_s4 + $0x40] sm:$0xff] }
  0xe7   :  { %v1890_v20 = vpack.c.bf16 %v618_v15, %v616_v14  ;;  %v439_v23 = vadd.f32 %v438_v19, %v114_v9 }
  0xe8   :  { %v619_v29 = vmax.f32 %v437_v21, 0.0  ;;  %1860 = vmatmul.mubr.msk.f32.gmra.mrb[80].mxu0 %vm775_vm2, %v751_v16  ;;  %v758_v16 = vld [vmem:[%s2981_s4 + $0x78] sm:$0xff] }
  0xe9   :  { %v442_v24 = vpop.f32.mrb[6].mxu0  ;;  %1891 = vmatprep.subr.bf16.mxu1 %v1890_v20  ;;  %v620_v31 = vmax.f32 %v439_v23, 0.0  ;;  %997 = vmatprep.mubr.f32.mxu0 %v2088_v3 }
  0xea   :  { %v443_v26 = vadd.f32 %v442_v24, %v119_v22  ;;  %v444_v27 = vpop.f32.mrb[7].mxu0  ;;  %1893 = vmatpush1.bf16.msra.mxu1 %v1892_v18 }
  0xeb   :  { %v445_v28 = vadd.f32 %v444_v27, %v119_v22 }
  0xec   :  { %v621_v30 = vmax.f32 %v443_v26, 0.0  ;;  %1861 = vmatmul.mubr.msk.f32.gmra.mrb[82].mxu0 %vm775_vm2, %v752_v25 }
  0xed   :  { %v622_v32 = vmax.f32 %v445_v28, 0.0  ;;  %v448_v33 = vpop.f32.mrb[8].mxu0  ;;  %v154_v28 = vpop.permute.xlu0 %153  ;;  %1003 = vmatprep.mubr.f32.mxu0 %v2088_v3 }
  0xee   :  { %v1896_v35 = vpack.c.bf16 %v621_v30, %v619_v29  ;;  %v450_v36 = vpop.f32.mrb[9].mxu0  ;;  %v449_v39 = vadd.f32 %v448_v33, %v124_v37 }
  0xef   :  { %v1894_v38 = vpack.c.bf16 %v622_v32, %v620_v31  ;;  %v451_v41 = vadd.f32 %v450_v36, %v124_v37  ;;  %v159_v31 = vpop.permute.xlu1 %158 }
  0xf0   :  { %v623_v47 = vmax.f32 %v449_v39, 0.0  ;;  %1862 = vmatmul.mubr.msk.f32.gmra.mrb[84].mxu0 %vm775_vm2, %v753_v34 }
  0xf1   :  { %v454_v42 = vpop.f32.mrb[10].mxu0  ;;  %1895 = vmatprep.subr.bf16.mxu1 %v1894_v38  ;;  %v624_v49 = vmax.f32 %v451_v41, 0.0  ;;  %1009 = vmatprep.mubr.f32.mxu0 %v2088_v3 }
  0xf2   :  { %v455_v44 = vadd.f32 %v454_v42, %v129_v40  ;;  %v456_v45 = vpop.f32.mrb[11].mxu0  ;;  %1897 = vmatpush1.bf16.msra.mxu1 %v1896_v35 }
  0xf3   :  { %v457_v46 = vadd.f32 %v456_v45, %v129_v40 }
  0xf4   :  { %v625_v48 = vmax.f32 %v455_v44, 0.0  ;;  %1863 = vmatmul.mubr.msk.f32.gmra.mrb[86].mxu0 %vm775_vm2, %v754_v43 }
  0xf5   :  { %v626_v50 = vmax.f32 %v457_v46, 0.0  ;;  %v460_v51 = vpop.f32.mrb[12].mxu0  ;;  %v164_v46 = vpop.permute.xlu0 %163  ;;  %1015 = vmatprep.mubr.f32.mxu0 %v2088_v3 }
  0xf6   :  { %v1900_v53 = vpack.c.bf16 %v625_v48, %v623_v47  ;;  %v462_v54 = vpop.f32.mrb[13].mxu0  ;;  %v461_v57 = vadd.f32 %v460_v51, %v134_v55 }
  0xf7   :  { %v1898_v56 = vpack.c.bf16 %v626_v50, %v624_v49  ;;  %v463_v59 = vadd.f32 %v462_v54, %v134_v55  ;;  %v169_v49 = vpop.permute.xlu1 %168 }
  0xf8   :  { %v627_v1 = vmax.f32 %v461_v57, 0.0  ;;  %1864 = vmatmul.mubr.msk.f32.gmra.mrb[88].mxu0 %vm775_vm2, %v755_v52 }
  0xf9   :  { %v466_v60 = vpop.f32.mrb[14].mxu0  ;;  %1899 = vmatprep.subr.bf16.mxu1 %v1898_v56  ;;  %v628_v4 = vmax.f32 %v463_v59, 0.0  ;;  %1021 = vmatprep.mubr.f32.mxu0 %v2088_v3 }
  0xfa   :  { %v467_v62 = vadd.f32 %v466_v60, %v139_v58  ;;  %v468_v63 = vpop.f32.mrb[15].mxu0  ;;  %1901 = vmatpush1.bf16.msra.mxu1 %v1900_v53 }
  0xfb   :  { %v469_v0 = vadd.f32 %v468_v63, %v139_v58 }
  0xfc   :  { %v629_v2 = vmax.f32 %v467_v62, 0.0  ;;  %1865 = vmatmul.mubr.msk.f32.gmra.mrb[90].mxu0 %vm775_vm2, %v756_v61 }
  0xfd   :  { %v630_v5 = vmax.f32 %v469_v0, 0.0  ;;  %v472_v6 = vpop.f32.mrb[16].mxu0  ;;  %v174_v0 = vpop.permute.xlu0 %173  ;;  %1027 = vmatprep.mubr.f32.mxu0 %v2088_v3 }
  0xfe   :  { %v1904_v8 = vpack.c.bf16 %v629_v2, %v627_v1  ;;  %v474_v9 = vpop.f32.mrb[17].mxu0  ;;  %v473_v12 = vadd.f32 %v472_v6, %v144_v10 }
  0xff   :  { %v1902_v11 = vpack.c.bf16 %v630_v5, %v628_v4  ;;  %v475_v14 = vadd.f32 %v474_v9, %v144_v10  ;;  %v179_v4 = vpop.permute.xlu1 %178 }
 0x100   :  { %v631_v20 = vmax.f32 %v473_v12, 0.0  ;;  %1866 = vmatmul.mubr.msk.f32.gmra.mrb[92].mxu0 %vm775_vm2, %v757_v7 }
 0x101   :  { %v478_v15 = vpop.f32.mrb[18].mxu0  ;;  %1903 = vmatprep.subr.bf16.mxu1 %v1902_v11  ;;  %v632_v22 = vmax.f32 %v475_v14, 0.0  ;;  %1033 = vmatprep.mubr.f32.mxu0 %v2088_v3 }
 0x102   :  { %v479_v17 = vadd.f32 %v478_v15, %v149_v13  ;;  %v480_v18 = vpop.f32.mrb[19].mxu0  ;;  %1905 = vmatpush1.bf16.msra.mxu1 %v1904_v8 }
 0x103   :  { %v481_v19 = vadd.f32 %v480_v18, %v149_v13 }
 0x104   :  { %v633_v21 = vmax.f32 %v479_v17, 0.0  ;;  %1867 = vmatmul.mubr.msk.f32.gmra.mrb[94].mxu0 %vm775_vm2, %v758_v16 }
 0x105   :  { %v634_v23 = vmax.f32 %v481_v19, 0.0  ;;  %v484_v24 = vpop.f32.mrb[20].mxu0  ;;  %v184_v19 = vpop.permute.xlu0 %183 }
 0x106   :  { %v1908_v26 = vpack.c.bf16 %v633_v21, %v631_v20  ;;  %v486_v27 = vpop.f32.mrb[21].mxu0  ;;  %v485_v30 = vadd.f32 %v484_v24, %v154_v28 }
 0x107   :  { %v1906_v29 = vpack.c.bf16 %v634_v23, %v632_v22  ;;  %v487_v32 = vadd.f32 %v486_v27, %v154_v28  ;;  %v189_v22 = vpop.permute.xlu1 %188 }
 0x108   :  { %v635_v38 = vmax.f32 %v485_v30, 0.0 }
 0x109   :  { %v490_v33 = vpop.f32.mrb[22].mxu0  ;;  %1907 = vmatprep.subr.bf16.mxu1 %v1906_v29  ;;  %v636_v40 = vmax.f32 %v487_v32, 0.0  ;;  %v194_v34 = vpop.permute.xlu0 %193 }
 0x10a   :  { %v491_v35 = vadd.f32 %v490_v33, %v159_v31  ;;  %v492_v36 = vpop.f32.mrb[23].mxu0  ;;  %1909 = vmatpush1.bf16.msra.mxu1 %v1908_v26 }
 0x10b   :  { %v493_v37 = vadd.f32 %v492_v36, %v159_v31 }
 0x10c   :  { %v637_v39 = vmax.f32 %v491_v35, 0.0 }
 0x10d   :  { %v638_v41 = vmax.f32 %v493_v37, 0.0  ;;  %v496_v42 = vpop.f32.mrb[24].mxu0  ;;  %v199_v37 = vpop.permute.xlu1 %198 }
 0x10e   :  { %v1912_v44 = vpack.c.bf16 %v637_v39, %v635_v38  ;;  %v498_v45 = vpop.f32.mrb[25].mxu0  ;;  %v497_v48 = vadd.f32 %v496_v42, %v164_v46 }
 0x10f   :  { %v1910_v47 = vpack.c.bf16 %v638_v41, %v636_v40  ;;  %v499_v50 = vadd.f32 %v498_v45, %v164_v46 }
 0x110   :  { %v639_v56 = vmax.f32 %v497_v48, 0.0 }
 0x111   :  { %v502_v51 = vpop.f32.mrb[26].mxu0  ;;  %1911 = vmatprep.subr.bf16.mxu1 %v1910_v47  ;;  %v640_v58 = vmax.f32 %v499_v50, 0.0  ;;  %v204_v50 = vpop.permute.xlu0 %203 }
 0x112   :  { %v503_v53 = vadd.f32 %v502_v51, %v169_v49  ;;  %v504_v54 = vpop.f32.mrb[27].mxu0  ;;  %1913 = vmatpush1.bf16.msra.mxu1 %v1912_v44 }
 0x113   :  { %v505_v55 = vadd.f32 %v504_v54, %v169_v49 }
 0x114   :  { %v641_v57 = vmax.f32 %v503_v53, 0.0  ;;  %v209_v53 = vpop.permute.xlu1 %208 }
 0x115   :  { %v642_v59 = vmax.f32 %v505_v55, 0.0  ;;  %v508_v60 = vpop.f32.mrb[28].mxu0 }
 0x116   :  { %v1916_v62 = vpack.c.bf16 %v641_v57, %v639_v56  ;;  %v510_v63 = vpop.f32.mrb[29].mxu0  ;;  %v509_v2 = vadd.f32 %v508_v60, %v174_v0 }
 0x117   :  { %v1914_v1 = vpack.c.bf16 %v642_v59, %v640_v58  ;;  %v511_v5 = vadd.f32 %v510_v63, %v174_v0 }
 0x118   :  { %v643_v11 = vmax.f32 %v509_v2, 0.0  ;;  %v214_v2 = vpop.permute.xlu0 %213 }
 0x119   :  { %v514_v6 = vpop.f32.mrb[30].mxu0  ;;  %1915 = vmatprep.subr.bf16.mxu1 %v1914_v1  ;;  %v644_v13 = vmax.f32 %v511_v5, 0.0 }
 0x11a   :  { %v515_v8 = vadd.f32 %v514_v6, %v179_v4  ;;  %v516_v9 = vpop.f32.mrb[31].mxu0  ;;  %1917 = vmatpush1.bf16.msra.mxu1 %v1916_v62  ;;  %v219_v6 = vpop.permute.xlu1 %218 }
 0x11b   :  { %v517_v10 = vadd.f32 %v516_v9, %v179_v4 }
 0x11c   :  { %v645_v12 = vmax.f32 %v515_v8, 0.0 }
 0x11d   :  { %v646_v14 = vmax.f32 %v517_v10, 0.0  ;;  %v520_v15 = vpop.f32.mrb[32].mxu0 }
 0x11e   :  { %v1920_v17 = vpack.c.bf16 %v645_v12, %v643_v11  ;;  %v522_v18 = vpop.f32.mrb[33].mxu0  ;;  %v521_v21 = vadd.f32 %v520_v15, %v184_v19 }
 0x11f   :  { %v1918_v20 = vpack.c.bf16 %v646_v14, %v644_v13  ;;  %v523_v23 = vadd.f32 %v522_v18, %v184_v19  ;;  %v224_v19 = vpop.permute.xlu0 %223 }
 0x120   :  { %v647_v27 = vmax.f32 %v521_v21, 0.0 }
 0x121   :  { %v526_v24 = vpop.f32.mrb[34].mxu0  ;;  %1919 = vmatprep.subr.bf16.mxu1 %v1918_v20  ;;  %v648_v29 = vmax.f32 %v523_v23, 0.0 }
 0x122   :  { %v527_v25 = vadd.f32 %v526_v24, %v189_v22  ;;  %v528_v3 = vpop.f32.mrb[35].mxu0  ;;  %1921 = vmatpush1.bf16.msra.mxu1 %v1920_v17 }
 0x123   :  { %v529_v26 = vadd.f32 %v528_v3, %v189_v22  ;;  %v229_v22 = vpop.permute.xlu1 %228 }
 0x124   :  { %v649_v28 = vmax.f32 %v527_v25, 0.0 }
 0x125   :  { %v650_v30 = vmax.f32 %v529_v26, 0.0  ;;  %v532_v31 = vpop.f32.mrb[36].mxu0 }
 0x126   :  { %v1924_v32 = vpack.c.bf16 %v649_v28, %v647_v27  ;;  %v534_v33 = vpop.f32.mrb[37].mxu0  ;;  %v533_v36 = vadd.f32 %v532_v31, %v194_v34 }
 0x127   :  { %v1922_v35 = vpack.c.bf16 %v650_v30, %v648_v29  ;;  %v535_v38 = vadd.f32 %v534_v33, %v194_v34  ;;  %v234_v34 = vpop.permute.xlu0 %233 }
 0x128   :  { %v651_v43 = vmax.f32 %v533_v36, 0.0 }
 0x129   :  { %v538_v39 = vpop.f32.mrb[38].mxu0  ;;  %1923 = vmatprep.subr.bf16.mxu1 %v1922_v35  ;;  %v652_v45 = vmax.f32 %v535_v38, 0.0 }
 0x12a   :  { %v539_v40 = vadd.f32 %v538_v39, %v199_v37  ;;  %v540_v41 = vpop.f32.mrb[39].mxu0  ;;  %1925 = vmatpush1.bf16.msra.mxu1 %v1924_v32 }
 0x12b   :  { %v541_v42 = vadd.f32 %v540_v41, %v199_v37  ;;  %v239_v37 = vpop.permute.xlu1 %238 }
 0x12c   :  { %v653_v44 = vmax.f32 %v539_v40, 0.0 }
 0x12d   :  { %v654_v46 = vmax.f32 %v541_v42, 0.0  ;;  %v544_v47 = vpop.f32.mrb[40].mxu0 }
 0x12e   :  { %v1928_v48 = vpack.c.bf16 %v653_v44, %v651_v43  ;;  %v546_v49 = vpop.f32.mrb[41].mxu0  ;;  %v545_v52 = vadd.f32 %v544_v47, %v204_v50 }
 0x12f   :  { %v1926_v51 = vpack.c.bf16 %v654_v46, %v652_v45  ;;  %v547_v54 = vadd.f32 %v546_v49, %v204_v50  ;;  %v244_v50 = vpop.permute.xlu0 %243 }
 0x130   :  { %v655_v59 = vmax.f32 %v545_v52, 0.0 }
 0x131   :  { %v550_v55 = vpop.f32.mrb[42].mxu0  ;;  %1927 = vmatprep.subr.bf16.mxu1 %v1926_v51  ;;  %v656_v61 = vmax.f32 %v547_v54, 0.0 }
 0x132   :  { %v551_v56 = vadd.f32 %v550_v55, %v209_v53  ;;  %v552_v57 = vpop.f32.mrb[43].mxu0  ;;  %1929 = vmatpush1.bf16.msra.mxu1 %v1928_v48 }
 0x133   :  { %v553_v58 = vadd.f32 %v552_v57, %v209_v53  ;;  %v249_v53 = vpop.permute.xlu1 %248 }
 0x134   :  { %v657_v60 = vmax.f32 %v551_v56, 0.0 }
 0x135   :  { %v658_v62 = vmax.f32 %v553_v58, 0.0  ;;  %v556_v63 = vpop.f32.mrb[44].mxu0 }
 0x136   :  { %v1932_v0 = vpack.c.bf16 %v657_v60, %v655_v59  ;;  %v558_v1 = vpop.f32.mrb[45].mxu0  ;;  %v557_v5 = vadd.f32 %v556_v63, %v214_v2 }
 0x137   :  { %v1930_v4 = vpack.c.bf16 %v658_v62, %v656_v61  ;;  %v559_v7 = vadd.f32 %v558_v1, %v214_v2  ;;  %v254_v2 = vpop.permute.xlu0 %253 }
 0x138   :  { %v659_v12 = vmax.f32 %v557_v5, 0.0 }
 0x139   :  { %v562_v8 = vpop.f32.mrb[46].mxu0  ;;  %1931 = vmatprep.subr.bf16.mxu1 %v1930_v4  ;;  %v660_v14 = vmax.f32 %v559_v7, 0.0 }
 0x13a   :  { %v563_v9 = vadd.f32 %v562_v8, %v219_v6  ;;  %v564_v10 = vpop.f32.mrb[47].mxu0  ;;  %1933 = vmatpush1.bf16.msra.mxu1 %v1932_v0 }
 0x13b   :  { %v565_v11 = vadd.f32 %v564_v10, %v219_v6  ;;  %v259_v6 = vpop.permute.xlu1 %258 }
 0x13c   :  { %v661_v13 = vmax.f32 %v563_v9, 0.0 }
 0x13d   :  { %v662_v15 = vmax.f32 %v565_v11, 0.0  ;;  %v568_v16 = vpop.f32.mrb[48].mxu0 }
 0x13e   :  { %v1936_v17 = vpack.c.bf16 %v661_v13, %v659_v12  ;;  %v570_v18 = vpop.f32.mrb[49].mxu0  ;;  %v569_v21 = vadd.f32 %v568_v16, %v224_v19 }
 0x13f   :  { %v1934_v20 = vpack.c.bf16 %v662_v15, %v660_v14  ;;  %v571_v23 = vadd.f32 %v570_v18, %v224_v19  ;;  %v679_v18 = vld [vmem:[%s2983_s3] sm:$0xff]  ;;  %v682_v19 = vld [vmem:[%s2983_s3 + $0x18] sm:$0xff] }
 0x140   :  { %v663_v27 = vmax.f32 %v569_v21, 0.0  ;;  %v684_v21 = vld [vmem:[%s2983_s3 + $0x28] sm:$0xff] }
 0x141   :  { %v574_v24 = vpop.f32.mrb[50].mxu0  ;;  %1935 = vmatprep.subr.bf16.mxu1 %v1934_v20  ;;  %v664_v29 = vmax.f32 %v571_v23, 0.0  ;;  %v681_v20 = vld [vmem:[%s2983_s3 + $0x10] sm:$0xff]  ;;  %v686_v23 = vld [vmem:[%s2983_s3 + $0x38] sm:$0xff] }
 0x142   :  { %v575_v25 = vadd.f32 %v574_v24, %v229_v22  ;;  %v576_v3 = vpop.f32.mrb[51].mxu0  ;;  %1937 = vmatpush1.bf16.msra.mxu1 %v1936_v17  ;;  %v685_v24 = vld [vmem:[%s2983_s3 + $0x30] sm:$0xff] }
 0x143   :  { %v577_v26 = vadd.f32 %v576_v3, %v229_v22  ;;  %v683_v22 = vld [vmem:[%s2983_s3 + $0x20] sm:$0xff] }
 0x144   :  { %v665_v28 = vmax.f32 %v575_v25, 0.0  ;;  %v688_v25 = vld [vmem:[%s2983_s3 + $0x48] sm:$0xff]  ;;  %v687_v3 = vld [vmem:[%s2983_s3 + $0x40] sm:$0xff] }
 0x145   :  { %v666_v30 = vmax.f32 %v577_v26, 0.0  ;;  %v580_v31 = vpop.f32.mrb[52].mxu0  ;;  %v690_v26 = vld [vmem:[%s2983_s3 + $0x58] sm:$0xff] }
 0x146   :  { %v1940_v32 = vpack.c.bf16 %v665_v28, %v663_v27  ;;  %v582_v33 = vpop.f32.mrb[53].mxu0  ;;  %v581_v36 = vadd.f32 %v580_v31, %v234_v34  ;;  %v689_v27 = vld [vmem:[%s2983_s3 + $0x50] sm:$0xff]  ;;  %v692_v28 = vld [vmem:[%s2983_s3 + $0x68] sm:$0xff] }
 0x147   :  { %v1938_v35 = vpack.c.bf16 %v666_v30, %v664_v29  ;;  %v583_v38 = vadd.f32 %v582_v33, %v234_v34  ;;  %v691_v29 = vld [vmem:[%s2983_s3 + $0x60] sm:$0xff]  ;;  %v694_v30 = vld [vmem:[%s2983_s3 + $0x78] sm:$0xff]  ;;  %v693_v31 = vld [vmem:[%s2983_s3 + $0x70] sm:$0xff] }
 0x148   :  { %v667_v43 = vmax.f32 %v581_v36, 0.0  ;;  %v695_v33 = vld [vmem:[%s2983_s3 + $0x80] sm:$0xff]  ;;  %v698_v34 = vld [vmem:[%s2983_s3 + $0x98] sm:$0xff]  ;;  %v700_v36 = vld [vmem:[%s2983_s3 + $0xa8] sm:$0xff] }
 0x149   :  { %v586_v39 = vpop.f32.mrb[54].mxu0  ;;  %1939 = vmatprep.subr.bf16.mxu1 %v1938_v35  ;;  %v668_v45 = vmax.f32 %v583_v38, 0.0  ;;  %v697_v35 = vld [vmem:[%s2983_s3 + $0x90] sm:$0xff]  ;;  %v702_v38 = vld [vmem:[%s2983_s3 + $0xb8] sm:$0xff] }
 0x14a   :  { %v587_v40 = vadd.f32 %v586_v39, %v239_v37  ;;  %v588_v41 = vpop.f32.mrb[55].mxu0  ;;  %1941 = vmatpush1.bf16.msra.mxu1 %v1940_v32  ;;  %v696_v32 = vld [vmem:[%s2983_s3 + $0x88] sm:$0xff]  ;;  %v701_v39 = vld [vmem:[%s2983_s3 + $0xb0] sm:$0xff] }
 0x14b   :  { %v589_v42 = vadd.f32 %v588_v41, %v239_v37  ;;  %v699_v37 = vld [vmem:[%s2983_s3 + $0xa0] sm:$0xff] }
 0x14c   :  { %v669_v44 = vmax.f32 %v587_v40, 0.0  ;;  %v704_v40 = vld [vmem:[%s2983_s3 + $0xc8] sm:$0xff]  ;;  %v703_v41 = vld [vmem:[%s2983_s3 + $0xc0] sm:$0xff] }
 0x14d   :  { %v670_v46 = vmax.f32 %v589_v42, 0.0  ;;  %v592_v47 = vpop.f32.mrb[56].mxu0  ;;  %v706_v42 = vld [vmem:[%s2983_s3 + $0xd8] sm:$0xff] }
 0x14e   :  { %v1944_v48 = vpack.c.bf16 %v669_v44, %v667_v43  ;;  %v594_v49 = vpop.f32.mrb[57].mxu0  ;;  %v593_v52 = vadd.f32 %v592_v47, %v244_v50  ;;  %v705_v43 = vld [vmem:[%s2983_s3 + $0xd0] sm:$0xff]  ;;  %v708_v44 = vld [vmem:[%s2983_s3 + $0xe8] sm:$0xff] }
 0x14f   :  { %v1942_v51 = vpack.c.bf16 %v670_v46, %v668_v45  ;;  %v595_v54 = vadd.f32 %v594_v49, %v244_v50  ;;  %v707_v45 = vld [vmem:[%s2983_s3 + $0xe0] sm:$0xff]  ;;  %v710_v46 = vld [vmem:[%s2983_s3 + $0xf8] sm:$0xff]  ;;  %v709_v47 = vld [vmem:[%s2983_s3 + $0xf0] sm:$0xff] }
 0x150   :  { %v671_v59 = vmax.f32 %v593_v52, 0.0  ;;  %v711_v49 = vld [vmem:[%s2983_s3 + $0x100] sm:$0xff]  ;;  %v714_v50 = vld [vmem:[%s2983_s3 + $0x118] sm:$0xff]  ;;  %v716_v52 = vld [vmem:[%s2983_s3 + $0x128] sm:$0xff] }
 0x151   :  { %v598_v55 = vpop.f32.mrb[58].mxu0  ;;  %1943 = vmatprep.subr.bf16.mxu1 %v1942_v51  ;;  %v672_v61 = vmax.f32 %v595_v54, 0.0  ;;  %v713_v51 = vld [vmem:[%s2983_s3 + $0x110] sm:$0xff]  ;;  %v718_v54 = vld [vmem:[%s2983_s3 + $0x138] sm:$0xff] }
 0x152   :  { %v599_v56 = vadd.f32 %v598_v55, %v249_v53  ;;  %v600_v57 = vpop.f32.mrb[59].mxu0  ;;  %1945 = vmatpush1.bf16.msra.mxu1 %v1944_v48  ;;  %v712_v48 = vld [vmem:[%s2983_s3 + $0x108] sm:$0xff]  ;;  %v717_v55 = vld [vmem:[%s2983_s3 + $0x130] sm:$0xff] }
 0x153   :  { %v601_v58 = vadd.f32 %v600_v57, %v249_v53  ;;  %v715_v53 = vld [vmem:[%s2983_s3 + $0x120] sm:$0xff] }
 0x154   :  { %v673_v60 = vmax.f32 %v599_v56, 0.0  ;;  %v720_v56 = vld [vmem:[%s2983_s3 + $0x148] sm:$0xff]  ;;  %v719_v57 = vld [vmem:[%s2983_s3 + $0x140] sm:$0xff] }
 0x155   :  { %v674_v62 = vmax.f32 %v601_v58, 0.0  ;;  %v604_v63 = vpop.f32.mrb[60].mxu0  ;;  %v722_v58 = vld [vmem:[%s2983_s3 + $0x158] sm:$0xff] }
 0x156   :  { %v1948_v0 = vpack.c.bf16 %v673_v60, %v671_v59  ;;  %v606_v1 = vpop.f32.mrb[61].mxu0  ;;  %v605_v5 = vadd.f32 %v604_v63, %v254_v2  ;;  %v721_v59 = vld [vmem:[%s2983_s3 + $0x150] sm:$0xff]  ;;  %v723_v63 = vld [vmem:[%s2983_s3 + $0x160] sm:$0xff] }
 0x157   :  { %v1946_v4 = vpack.c.bf16 %v674_v62, %v672_v61  ;;  %v607_v7 = vadd.f32 %v606_v1, %v254_v2  ;;  %v724_v61 = vld [vmem:[%s2983_s3 + $0x168] sm:$0xff] }
 0x158   :  { %v675_v12 = vmax.f32 %v605_v5, 0.0  ;;  %v728_v5 = vld [vmem:[%s2983_s3 + $0x188] sm:$0xff] }
 0x159   :  { %v610_v8 = vpop.f32.mrb[62].mxu0  ;;  %1947 = vmatprep.subr.bf16.mxu1 %v1946_v4  ;;  %v676_v14 = vmax.f32 %v607_v7, 0.0  ;;  %v725_v4 = vld [vmem:[%s2983_s3 + $0x170] sm:$0xff] }
 0x15a   :  { %v611_v9 = vadd.f32 %v610_v8, %v259_v6  ;;  %v612_v10 = vpop.f32.mrb[63].mxu0  ;;  %1949 = vmatpush1.bf16.msra.mxu1 %v1948_v0  ;;  %v726_v0 = vld [vmem:[%s2983_s3 + $0x178] sm:$0xff]  ;;  %v727_v8 = vld [vmem:[%s2983_s3 + $0x180] sm:$0xff] }
 0x15b   :  { %v613_v11 = vadd.f32 %v612_v10, %v259_v6 }
 0x15c   :  { %v677_v13 = vmax.f32 %v611_v9, 0.0  ;;  %v730_v9 = vld [vmem:[%s2983_s3 + $0x198] sm:$0xff] }
 0x15d   :  { %v678_v15 = vmax.f32 %v613_v11, 0.0  ;;  %v2810_v60 = vpop.f32.mrb[64].mxu0 }
 0x15e   :  { %v1952_v16 = vpack.c.bf16 %v677_v13, %v675_v12  ;;  %v2815_v62 = vpop.f32.mrb[65].mxu0  ;;  %v729_v12 = vld [vmem:[%s2983_s3 + $0x190] sm:$0xff]  ;;  %v732_v13 = vld [vmem:[%s2983_s3 + $0x1a8] sm:$0xff] }
 0x15f   :  { %v1950_v17 = vpack.c.bf16 %v678_v15, %v676_v14 }
 0x161   :  { %1951 = vmatprep.subr.bf16.mxu1 %v1950_v17  ;;  %v2823_v1 = vpop.f32.mrb[66].mxu0  ;;  %v734_v17 = vld [vmem:[%s2983_s3 + $0x1b8] sm:$0xff] }
 0x162   :  { %1953 = vmatpush1.bf16.msra.mxu1 %v1952_v16  ;;  %v2825_v2 = vpop.f32.mrb[67].mxu0  ;;  %v731_v16 = vld [vmem:[%s2983_s3 + $0x1a0] sm:$0xff] }
 0x165   :  { %1201 = vmatmul.mubr.f32.vlgmr.msra.gmra.mrb[32].mxu1 %v679_v18  ;;  %v2833_v6 = vpop.f32.mrb[68].mxu0 }
 0x166   :  { %1206 = vmatprep.mubr.f32.mxu1 %v682_v19  ;;  %v2835_v7 = vpop.f32.mrb[69].mxu0 }
 0x169   :  { %1207 = vmatmul.mubr.f32.gmra.mrb[34].mxu1 %v681_v20  ;;  %v2843_v10 = vpop.f32.mrb[70].mxu0  ;;  %v733_v20 = vld [vmem:[%s2983_s3 + $0x1b0] sm:$0xff] }
 0x16a   :  { %1212 = vmatprep.mubr.f32.mxu1 %v684_v21  ;;  %v2845_v11 = vpop.f32.mrb[71].mxu0  ;;  %v736_v21 = vld [vmem:[%s2983_s3 + $0x1c8] sm:$0xff] }
 0x16d   :  { %1213 = vmatmul.mubr.f32.gmra.mrb[36].mxu1 %v683_v22  ;;  %v2853_v14 = vpop.f32.mrb[72].mxu0 }
 0x16e   :  { %1218 = vmatprep.mubr.f32.mxu1 %v686_v23  ;;  %v2855_v15 = vpop.f32.mrb[73].mxu0 }
 0x171   :  { %1219 = vmatmul.mubr.f32.gmra.mrb[38].mxu1 %v685_v24  ;;  %v2863_v18 = vpop.f32.mrb[74].mxu0  ;;  %v735_v24 = vld [vmem:[%s2983_s3 + $0x1c0] sm:$0xff] }
 0x172   :  { %1224 = vmatprep.mubr.f32.mxu1 %v688_v25  ;;  %v2865_v19 = vpop.f32.mrb[75].mxu0  ;;  %v738_v25 = vld [vmem:[%s2983_s3 + $0x1d8] sm:$0xff] }
 0x175   :  { %1225 = vmatmul.mubr.f32.gmra.mrb[40].mxu1 %v687_v3  ;;  %v2873_v22 = vpop.f32.mrb[76].mxu0 }
 0x176   :  { %1230 = vmatprep.mubr.f32.mxu1 %v690_v26  ;;  %v2875_v23 = vpop.f32.mrb[77].mxu0 }
 0x179   :  { %1231 = vmatmul.mubr.f32.gmra.mrb[42].mxu1 %v689_v27  ;;  %v737_v27 = vld [vmem:[%s2983_s3 + $0x1d0] sm:$0xff] }
 0x17a   :  { %1236 = vmatprep.mubr.f32.mxu1 %v692_v28  ;;  %v740_v28 = vld [vmem:[%s2983_s3 + $0x1e8] sm:$0xff] }
 0x17d   :  { %1237 = vmatmul.mubr.f32.gmra.mrb[44].mxu1 %v691_v29 }
 0x17e   :  { %1242 = vmatprep.mubr.f32.mxu1 %v694_v30 }
 0x181   :  { %1243 = vmatmul.mubr.f32.gmra.mrb[46].mxu1 %v693_v31  ;;  %v739_v31 = vld [vmem:[%s2983_s3 + $0x1e0] sm:$0xff] }
 0x182   :  { %1248 = vmatprep.mubr.f32.mxu1 %v696_v32  ;;  %v742_v32 = vld [vmem:[%s2983_s3 + $0x1f8] sm:$0xff] }
 0x185   :  { %1249 = vmatmul.mubr.f32.gmra.mrb[48].mxu1 %v695_v33 }
 0x186   :  { %1254 = vmatprep.mubr.f32.mxu1 %v698_v34 }
 0x189   :  { %1255 = vmatmul.mubr.f32.gmra.mrb[50].mxu1 %v697_v35  ;;  %v741_v35 = vld [vmem:[%s2983_s3 + $0x1f0] sm:$0xff] }
 0x18a   :  { %1260 = vmatprep.mubr.f32.mxu1 %v700_v36 }
 0x18d   :  { %1261 = vmatmul.mubr.f32.gmra.mrb[52].mxu1 %v699_v37 }
 0x18e   :  { %1266 = vmatprep.mubr.f32.mxu1 %v702_v38 }
 0x191   :  { %1267 = vmatmul.mubr.f32.gmra.mrb[54].mxu1 %v701_v39 }
 0x192   :  { %1272 = vmatprep.mubr.f32.mxu1 %v704_v40 }
 0x195   :  { %1273 = vmatmul.mubr.f32.gmra.mrb[56].mxu1 %v703_v41 }
 0x196   :  { %1278 = vmatprep.mubr.f32.mxu1 %v706_v42 }
 0x199   :  { %1279 = vmatmul.mubr.f32.gmra.mrb[58].mxu1 %v705_v43 }
 0x19a   :  { %1284 = vmatprep.mubr.f32.mxu1 %v708_v44 }
 0x19d   :  { %1285 = vmatmul.mubr.f32.gmra.mrb[60].mxu1 %v707_v45 }
 0x19e   :  { %1290 = vmatprep.mubr.f32.mxu1 %v710_v46 }
 0x1a1   :  { %1291 = vmatmul.mubr.f32.gmra.mrb[62].mxu1 %v709_v47 }
 0x1a2   :  { %1296 = vmatprep.mubr.f32.mxu1 %v712_v48 }
 0x1a5   :  { %1297 = vmatmul.mubr.f32.gmra.mrb[0].mxu1 %v711_v49 }
 0x1a6   :  { %1302 = vmatprep.mubr.f32.mxu1 %v714_v50 }
 0x1a9   :  { %1303 = vmatmul.mubr.f32.gmra.mrb[2].mxu1 %v713_v51 }
 0x1aa   :  { %1308 = vmatprep.mubr.f32.mxu1 %v716_v52  ;;  %v1428_v52 = vpop.permute.xlu0 %1427 }
 0x1ad   :  { %1309 = vmatmul.mubr.f32.gmra.mrb[4].mxu1 %v715_v53 }
 0x1ae   :  { %1314 = vmatprep.mubr.f32.mxu1 %v718_v54  ;;  %v2939_v54 = vld.sshfl [vmem:[%s2984_s6] sm:$0x33 pattern:$0x76325410] }
 0x1b1   :  { %1315 = vmatmul.mubr.f32.gmra.mrb[6].mxu1 %v717_v55 }
 0x1b2   :  { %1320 = vmatprep.mubr.f32.mxu1 %v720_v56 }
 0x1b5   :  { %1321 = vmatmul.mubr.f32.gmra.mrb[8].mxu1 %v719_v57 }
 0x1b6   :  { %1326 = vmatprep.mubr.f32.mxu1 %v722_v58  ;;  %v1728_v58 = vcombine.high %v2939_v54, %v2939_v54 }
 0x1b7   :  { %v2883_v3 = vpop.f32.mrb[78].mxu0 }
 0x1b8   :  { %v2885_v26 = vpop.f32.mrb[79].mxu0 }
 0x1b9   :  { %1327 = vmatmul.mubr.f32.gmra.mrb[10].mxu1 %v721_v59  ;;  %v1433_v59 = vpop.permute.xlu1 %1432 }
 0x1ba   :  { %1332 = vmatprep.mubr.f32.mxu1 %v724_v61 }
 0x1bb   :  { %v2893_v29 = vpop.f32.mrb[80].mxu0 }
 0x1bc   :  { %v2895_v30 = vpop.f32.mrb[81].mxu0 }
 0x1bd   :  { %1333 = vmatmul.mubr.f32.gmra.mrb[12].mxu1 %v723_v63 }
 0x1be   :  { %1338 = vmatprep.mubr.f32.mxu1 %v726_v0 }
 0x1bf   :  { %v2903_v33 = vpop.f32.mrb[82].mxu0 }
 0x1c0   :  { %v2905_v34 = vpop.f32.mrb[83].mxu0 }
 0x1c1   :  { %1339 = vmatmul.mubr.f32.gmra.mrb[14].mxu1 %v725_v4 }
 0x1c2   :  { %1344 = vmatprep.mubr.f32.mxu1 %v728_v5 }
 0x1c3   :  { %v2910_v36 = vpop.f32.mrb[84].mxu0 }
 0x1c4   :  { %v2912_v37 = vpop.f32.mrb[85].mxu0 }
 0x1c5   :  { %1345 = vmatmul.mubr.f32.gmra.mrb[16].mxu1 %v727_v8 }
 0x1c6   :  { %1350 = vmatprep.mubr.f32.mxu1 %v730_v9 }
 0x1c7   :  { %v2914_v38 = vpop.f32.mrb[86].mxu0 }
 0x1c8   :  { %v2916_v39 = vpop.f32.mrb[87].mxu0 }
 0x1c9   :  { %1351 = vmatmul.mubr.f32.gmra.mrb[18].mxu1 %v729_v12 }
 0x1ca   :  { %1356 = vmatprep.mubr.f32.mxu1 %v732_v13 }
 0x1cb   :  { %v2918_v40 = vpop.f32.mrb[88].mxu0 }
 0x1cc   :  { %v2920_v41 = vpop.f32.mrb[89].mxu0 }
 0x1cd   :  { %1357 = vmatmul.mubr.f32.gmra.mrb[20].mxu1 %v731_v16 }
 0x1ce   :  { %1362 = vmatprep.mubr.f32.mxu1 %v734_v17  ;;  %v1438_v17 = vpop.permute.xlu0 %1437 }
 0x1cf   :  { %v2922_v42 = vpop.f32.mrb[90].mxu0 }
 0x1d0   :  { %v2924_v43 = vpop.f32.mrb[91].mxu0 }
 0x1d1   :  { %1363 = vmatmul.mubr.f32.gmra.mrb[22].mxu1 %v733_v20 }
 0x1d2   :  { %1368 = vmatprep.mubr.f32.mxu1 %v736_v21 }
 0x1d3   :  { %v2926_v44 = vpop.f32.mrb[92].mxu0 }
 0x1d4   :  { %v2928_v45 = vpop.f32.mrb[93].mxu0 }
 0x1d5   :  { %1369 = vmatmul.mubr.f32.gmra.mrb[24].mxu1 %v735_v24 }
 0x1d6   :  { %1374 = vmatprep.mubr.f32.mxu1 %v738_v25 }
 0x1d7   :  { %v2930_v46 = vpop.f32.mrb[94].mxu0 }
 0x1d8   :  { %v2932_v47 = vpop.f32.mrb[95].mxu0 }
 0x1d9   :  { %1375 = vmatmul.mubr.f32.gmra.mrb[26].mxu1 %v737_v27  ;;  %v1443_v27 = vpop.permute.xlu1 %1442 }
 0x1da   :  { %1380 = vmatprep.mubr.f32.mxu1 %v740_v28 }
 0x1dd   :  { %1381 = vmatmul.mubr.f32.gmra.mrb[28].mxu1 %v739_v31 }
 0x1de   :  { %1386 = vmatprep.mubr.f32.mxu1 %v742_v32 }
 0x1e1   :  { %1387 = vmatmul.mubr.f32.gmra.mrb[30].mxu1 %v741_v35 }
 0x1e2   :  { %1795 = vmatprep.mubr.f32.mxu1 %v1728_v58 }
 0x238   :  { %v1202_v48 = vpop.f32.mrb[32].mxu1 }
 0x239   :  { %v1203_v49 = vadd.f32 %v1202_v48, %v2810_v60  ;;  %v1204_v50 = vpop.f32.mrb[33].mxu1 }
 0x23a   :  { %v1205_v51 = vadd.f32 %v1204_v50, %v2815_v62 }
 0x23b   :  { %v1585_v55 = vadd.f32 %v1428_v52, %v1203_v49 }
 0x23c   :  { %v1208_v53 = vpop.f32.mrb[34].mxu1  ;;  %v1586_v61 = vadd.f32 %v1428_v52, %v1205_v51 }
 0x23d   :  { %v1209_v56 = vadd.f32 %v1208_v53, %v2823_v1  ;;  %v1210_v57 = vpop.f32.mrb[35].mxu1  ;;  %v1649_v4 = vmax.f32 %v1585_v55, 0.0  ;;  %v1448_v55 = vpop.permute.xlu0 %1447 }
 0x23e   :  { %v1211_v60 = vadd.f32 %v1210_v57, %v2825_v2  ;;  %v1650_v12 = vmax.f32 %v1586_v61, 0.0  ;;  %v1453_v61 = vpop.permute.xlu1 %1452 }
 0x23f   :  { %v1587_v63 = vadd.f32 %v1433_v59, %v1209_v56 }
 0x240   :  { %v1588_v62 = vadd.f32 %v1433_v59, %v1211_v60  ;;  %v1214_v0 = vpop.f32.mrb[36].mxu1 }
 0x241   :  { %v1651_v5 = vmax.f32 %v1587_v63, 0.0  ;;  %v1215_v8 = vadd.f32 %v1214_v0, %v2833_v6  ;;  %v1216_v9 = vpop.f32.mrb[37].mxu1 }
 0x242   :  { %v1652_v13 = vmax.f32 %v1588_v62, 0.0  ;;  %v1217_v1 = vadd.f32 %v1216_v9, %v2835_v7 }
 0x243   :  { %v1956_v16 = vpack.c.bf16 %v1651_v5, %v1649_v4  ;;  %v1589_v24 = vadd.f32 %v1438_v17, %v1215_v8 }
 0x244   :  { %v1220_v20 = vpop.f32.mrb[38].mxu1  ;;  %v1954_v21 = vpack.c.bf16 %v1652_v13, %v1650_v12  ;;  %v1590_v28 = vadd.f32 %v1438_v17, %v1217_v1  ;;  %v1458_v1 = vpop.permute.xlu0 %1457 }
 0x245   :  { %v1221_v2 = vadd.f32 %v1220_v20, %v2843_v10  ;;  %v1222_v25 = vpop.f32.mrb[39].mxu1  ;;  %v1653_v48 = vmax.f32 %v1589_v24, 0.0  ;;  %v1463_v24 = vpop.permute.xlu1 %1462 }
 0x246   :  { %v1223_v31 = vadd.f32 %v1222_v25, %v2845_v11  ;;  %1955 = vmatprep.subr.bf16.mxu1 %v1954_v21  ;;  %v1654_v51 = vmax.f32 %v1590_v28, 0.0 }
 0x247   :  { %v1591_v32 = vadd.f32 %v1443_v27, %v1221_v2  ;;  %1957 = vmatpush1.bf16.msra.mxu1 %v1956_v16 }
 0x248   :  { %v1592_v6 = vadd.f32 %v1443_v27, %v1223_v31  ;;  %v1226_v35 = vpop.f32.mrb[40].mxu1 }
 0x249   :  { %v1655_v49 = vmax.f32 %v1591_v32, 0.0  ;;  %v1227_v7 = vadd.f32 %v1226_v35, %v2853_v14  ;;  %v1228_v50 = vpop.f32.mrb[41].mxu1 }
 0x24a   :  { %v1656_v52 = vmax.f32 %v1592_v6, 0.0  ;;  %v1229_v53 = vadd.f32 %v1228_v50, %v2855_v15 }
 0x24b   :  { %v1960_v10 = vpack.c.bf16 %v1655_v49, %v1653_v48  ;;  %v1593_v58 = vadd.f32 %v1448_v55, %v1227_v7  ;;  %v1468_v7 = vpop.permute.xlu0 %1467 }
 0x24c   :  { %v1232_v56 = vpop.f32.mrb[42].mxu1  ;;  %v1958_v57 = vpack.c.bf16 %v1656_v52, %v1654_v51  ;;  %v1594_v60 = vadd.f32 %v1448_v55, %v1229_v53 }
 0x24d   :  { %v1233_v11 = vadd.f32 %v1232_v56, %v2863_v18  ;;  %v1234_v59 = vpop.f32.mrb[43].mxu1  ;;  %v1657_v4 = vmax.f32 %v1593_v58, 0.0 }
 0x24e   :  { %v1235_v63 = vadd.f32 %v1234_v59, %v2865_v19  ;;  %1959 = vmatprep.subr.bf16.mxu1 %v1958_v57  ;;  %v1658_v9 = vmax.f32 %v1594_v60, 0.0 }
 0x24f   :  { %v1595_v62 = vadd.f32 %v1453_v61, %v1233_v11  ;;  %1961 = vmatpush1.bf16.msra.mxu1 %v1960_v10  ;;  %v1473_v10 = vpop.permute.xlu1 %1472 }
 0x250   :  { %v1596_v14 = vadd.f32 %v1453_v61, %v1235_v63  ;;  %v1238_v0 = vpop.f32.mrb[44].mxu1 }
 0x251   :  { %v1659_v5 = vmax.f32 %v1595_v62, 0.0  ;;  %v1239_v15 = vadd.f32 %v1238_v0, %v2873_v22  ;;  %v1240_v8 = vpop.f32.mrb[45].mxu1 }
 0x252   :  { %v1660_v12 = vmax.f32 %v1596_v14, 0.0  ;;  %v1241_v13 = vadd.f32 %v1240_v8, %v2875_v23  ;;  %v1478_v14 = vpop.permute.xlu0 %1477 }
 0x253   :  { %v1964_v18 = vpack.c.bf16 %v1659_v5, %v1657_v4  ;;  %v1597_v20 = vadd.f32 %v1458_v1, %v1239_v15  ;;  %v1483_v8 = vpop.permute.xlu1 %1482 }
 0x254   :  { %v1244_v16 = vpop.f32.mrb[46].mxu1  ;;  %v1962_v17 = vpack.c.bf16 %v1660_v12, %v1658_v9  ;;  %v1598_v2 = vadd.f32 %v1458_v1, %v1241_v13 }
 0x255   :  { %v1245_v19 = vadd.f32 %v1244_v16, %v2883_v3  ;;  %v1246_v21 = vpop.f32.mrb[47].mxu1  ;;  %v1661_v31 = vmax.f32 %v1597_v20, 0.0 }
 0x256   :  { %v1247_v25 = vadd.f32 %v1246_v21, %v2885_v26  ;;  %1963 = vmatprep.subr.bf16.mxu1 %v1962_v17  ;;  %v1662_v35 = vmax.f32 %v1598_v2, 0.0 }
 0x257   :  { %v1599_v27 = vadd.f32 %v1463_v24, %v1245_v19  ;;  %1965 = vmatpush1.bf16.msra.mxu1 %v1964_v18 }
 0x258   :  { %v1600_v22 = vadd.f32 %v1463_v24, %v1247_v25  ;;  %v1250_v28 = vpop.f32.mrb[48].mxu1  ;;  %v1488_v24 = vpop.permute.xlu0 %1487 }
 0x259   :  { %v1663_v32 = vmax.f32 %v1599_v27, 0.0  ;;  %v1251_v23 = vadd.f32 %v1250_v28, %v2893_v29  ;;  %v1252_v6 = vpop.f32.mrb[49].mxu1  ;;  %v1493_v28 = vpop.permute.xlu1 %1492 }
 0x25a   :  { %v1664_v48 = vmax.f32 %v1600_v22, 0.0  ;;  %v1253_v49 = vadd.f32 %v1252_v6, %v2895_v30 }
 0x25b   :  { %v1968_v3 = vpack.c.bf16 %v1663_v32, %v1661_v31  ;;  %v1601_v52 = vadd.f32 %v1468_v7, %v1251_v23 }
 0x25c   :  { %v1256_v50 = vpop.f32.mrb[50].mxu1  ;;  %v1966_v51 = vpack.c.bf16 %v1664_v48, %v1662_v35  ;;  %v1602_v55 = vadd.f32 %v1468_v7, %v1253_v49 }
 0x25d   :  { %v1257_v26 = vadd.f32 %v1256_v50, %v2903_v33  ;;  %v1258_v53 = vpop.f32.mrb[51].mxu1  ;;  %v1665_v11 = vmax.f32 %v1601_v52, 0.0 }
 0x25e   :  { %v1259_v56 = vadd.f32 %v1258_v53, %v2905_v34  ;;  %1967 = vmatprep.subr.bf16.mxu1 %v1966_v51  ;;  %v1666_v60 = vmax.f32 %v1602_v55, 0.0  ;;  %v1498_v51 = vpop.permute.xlu0 %1497  ;;  %v1503_v55 = vpop.permute.xlu1 %1502 }
 0x25f   :  { %v1603_v57 = vadd.f32 %v1473_v10, %v1257_v26  ;;  %1969 = vmatpush1.bf16.msra.mxu1 %v1968_v3 }
 0x260   :  { %v1604_v29 = vadd.f32 %v1473_v10, %v1259_v56  ;;  %v1262_v58 = vpop.f32.mrb[52].mxu1 }
 0x261   :  { %v1667_v59 = vmax.f32 %v1603_v57, 0.0  ;;  %v1263_v30 = vadd.f32 %v1262_v58, %v2910_v36  ;;  %v1264_v61 = vpop.f32.mrb[53].mxu1 }
 0x262   :  { %v1668_v63 = vmax.f32 %v1604_v29, 0.0  ;;  %v1265_v62 = vadd.f32 %v1264_v61, %v2912_v37 }
 0x263   :  { %v1972_v33 = vpack.c.bf16 %v1667_v59, %v1665_v11  ;;  %v1605_v5 = vadd.f32 %v1478_v14, %v1263_v30  ;;  %v1508_v30 = vpop.permute.xlu0 %1507 }
 0x264   :  { %v1268_v0 = vpop.f32.mrb[54].mxu1  ;;  %v1970_v4 = vpack.c.bf16 %v1668_v63, %v1666_v60  ;;  %v1606_v9 = vadd.f32 %v1478_v14, %v1265_v62 }
 0x265   :  { %v1269_v34 = vadd.f32 %v1268_v0, %v2914_v38  ;;  %v1270_v15 = vpop.f32.mrb[55].mxu1  ;;  %v1669_v1 = vmax.f32 %v1605_v5, 0.0 }
 0x266   :  { %v1271_v12 = vadd.f32 %v1270_v15, %v2916_v39  ;;  %1971 = vmatprep.subr.bf16.mxu1 %v1970_v4  ;;  %v1670_v20 = vmax.f32 %v1606_v9, 0.0 }
 0x267   :  { %v1607_v13 = vadd.f32 %v1483_v8, %v1269_v34  ;;  %1973 = vmatpush1.bf16.msra.mxu1 %v1972_v33  ;;  %v1513_v33 = vpop.permute.xlu1 %1512 }
 0x268   :  { %v1608_v36 = vadd.f32 %v1483_v8, %v1271_v12  ;;  %v1274_v18 = vpop.f32.mrb[56].mxu1 }
 0x269   :  { %v1671_v16 = vmax.f32 %v1607_v13, 0.0  ;;  %v1275_v37 = vadd.f32 %v1274_v18, %v2918_v40  ;;  %v1276_v17 = vpop.f32.mrb[57].mxu1  ;;  %v1518_v18 = vpop.permute.xlu0 %1517 }
 0x26a   :  { %v1672_v19 = vmax.f32 %v1608_v36, 0.0  ;;  %v1277_v21 = vadd.f32 %v1276_v17, %v2920_v41 }
 0x26b   :  { %v1976_v38 = vpack.c.bf16 %v1671_v16, %v1669_v1  ;;  %v1609_v27 = vadd.f32 %v1488_v24, %v1275_v37  ;;  %v1523_v37 = vpop.permute.xlu1 %1522 }
 0x26c   :  { %v1280_v2 = vpop.f32.mrb[58].mxu1  ;;  %v1974_v25 = vpack.c.bf16 %v1672_v19, %v1670_v20  ;;  %v1610_v31 = vadd.f32 %v1488_v24, %v1277_v21 }
 0x26d   :  { %v1281_v39 = vadd.f32 %v1280_v2, %v2922_v42  ;;  %v1282_v22 = vpop.f32.mrb[59].mxu1  ;;  %v1673_v35 = vmax.f32 %v1609_v27, 0.0 }
 0x26e   :  { %v1283_v32 = vadd.f32 %v1282_v22, %v2924_v43  ;;  %1975 = vmatprep.subr.bf16.mxu1 %v1974_v25  ;;  %v1674_v3 = vmax.f32 %v1610_v31, 0.0  ;;  %v1528_v31 = vpop.permute.xlu0 %1527 }
 0x26f   :  { %v1611_v23 = vadd.f32 %v1493_v28, %v1281_v39  ;;  %1977 = vmatpush1.bf16.msra.mxu1 %v1976_v38 }
 0x270   :  { %v1612_v40 = vadd.f32 %v1493_v28, %v1283_v32  ;;  %v1286_v6 = vpop.f32.mrb[60].mxu1 }
 0x271   :  { %v1675_v48 = vmax.f32 %v1611_v23, 0.0  ;;  %v1287_v41 = vadd.f32 %v1286_v6, %v2926_v44  ;;  %v1288_v49 = vpop.f32.mrb[61].mxu1 }
 0x272   :  { %v1676_v7 = vmax.f32 %v1612_v40, 0.0  ;;  %v1289_v50 = vadd.f32 %v1288_v49, %v2928_v45  ;;  %v1533_v40 = vpop.permute.xlu1 %1532 }
 0x273   :  { %v1980_v42 = vpack.c.bf16 %v1675_v48, %v1673_v35  ;;  %v1613_v53 = vadd.f32 %v1498_v51, %v1287_v41 }
 0x274   :  { %v1292_v52 = vpop.f32.mrb[62].mxu1  ;;  %v1978_v26 = vpack.c.bf16 %v1676_v7, %v1674_v3  ;;  %v1614_v56 = vadd.f32 %v1498_v51, %v1289_v50 }
 0x275   :  { %v1293_v43 = vadd.f32 %v1292_v52, %v2930_v46  ;;  %v1294_v10 = vpop.f32.mrb[63].mxu1  ;;  %v1677_v11 = vmax.f32 %v1613_v53, 0.0  ;;  %v1538_v53 = vpop.permute.xlu0 %1537 }
 0x276   :  { %v1295_v57 = vadd.f32 %v1294_v10, %v2932_v47  ;;  %1979 = vmatprep.subr.bf16.mxu1 %v1978_v26  ;;  %v1678_v61 = vmax.f32 %v1614_v56, 0.0 }
 0x277   :  { %v1615_v29 = vadd.f32 %v1503_v55, %v1293_v43  ;;  %1981 = vmatpush1.bf16.msra.mxu1 %v1980_v42 }
 0x278   :  { %v1616_v44 = vadd.f32 %v1503_v55, %v1295_v57  ;;  %v1298_v58 = vpop.f32.mrb[0].mxu1  ;;  %v1543_v55 = vpop.permute.xlu1 %1542 }
 0x279   :  { %v1679_v59 = vmax.f32 %v1615_v29, 0.0  ;;  %v1300_v45 = vpop.f32.mrb[1].mxu1  ;;  %v1617_v62 = vadd.f32 %v1508_v30, %v1298_v58 }
 0x27a   :  { %v1680_v60 = vmax.f32 %v1616_v44, 0.0  ;;  %v1618_v46 = vadd.f32 %v1508_v30, %v1300_v45 }
 0x27b   :  { %v1984_v63 = vpack.c.bf16 %v1679_v59, %v1677_v11  ;;  %v1681_v34 = vmax.f32 %v1617_v62, 0.0  ;;  %v1548_v62 = vpop.permute.xlu0 %1547 }
 0x27c   :  { %v1304_v14 = vpop.f32.mrb[2].mxu1  ;;  %v1982_v0 = vpack.c.bf16 %v1680_v60, %v1678_v61  ;;  %v1682_v8 = vmax.f32 %v1618_v46, 0.0 }
 0x27d   :  { %v1619_v4 = vadd.f32 %v1513_v33, %v1304_v14  ;;  %v1306_v5 = vpop.f32.mrb[3].mxu1  ;;  %v1553_v14 = vpop.permute.xlu1 %1552 }
 0x27e   :  { %v1620_v47 = vadd.f32 %v1513_v33, %v1306_v5  ;;  %1983 = vmatprep.subr.bf16.mxu1 %v1982_v0 }
 0x27f   :  { %v1683_v15 = vmax.f32 %v1619_v4, 0.0  ;;  %1985 = vmatpush1.bf16.msra.mxu1 %v1984_v63 }
 0x280   :  { %v1684_v9 = vmax.f32 %v1620_v47, 0.0  ;;  %v1310_v12 = vpop.f32.mrb[4].mxu1 }
 0x281   :  { %v1988_v13 = vpack.c.bf16 %v1683_v15, %v1681_v34  ;;  %v1312_v36 = vpop.f32.mrb[5].mxu1  ;;  %v1621_v16 = vadd.f32 %v1518_v18, %v1310_v12 }
 0x282   :  { %v1986_v1 = vpack.c.bf16 %v1684_v9, %v1682_v8  ;;  %v1622_v17 = vadd.f32 %v1518_v18, %v1312_v36 }
 0x283   :  { %v1685_v24 = vmax.f32 %v1621_v16, 0.0 }
 0x284   :  { %v1316_v20 = vpop.f32.mrb[6].mxu1  ;;  %1987 = vmatprep.subr.bf16.mxu1 %v1986_v1  ;;  %v1686_v25 = vmax.f32 %v1622_v17, 0.0  ;;  %v1558_v1 = vpop.permute.xlu0 %1557 }
 0x285   :  { %v1623_v19 = vadd.f32 %v1523_v37, %v1316_v20  ;;  %v1318_v21 = vpop.f32.mrb[7].mxu1  ;;  %1989 = vmatpush1.bf16.msra.mxu1 %v1988_v13  ;;  %v1563_v17 = vpop.permute.xlu1 %1562 }
 0x286   :  { %v1624_v38 = vadd.f32 %v1523_v37, %v1318_v21 }
 0x287   :  { %v1687_v2 = vmax.f32 %v1623_v19, 0.0 }
 0x288   :  { %v1688_v27 = vmax.f32 %v1624_v38, 0.0  ;;  %v1322_v39 = vpop.f32.mrb[8].mxu1 }
 0x289   :  { %v1992_v22 = vpack.c.bf16 %v1687_v2, %v1685_v24  ;;  %v1324_v28 = vpop.f32.mrb[9].mxu1  ;;  %v1625_v23 = vadd.f32 %v1528_v31, %v1322_v39 }
 0x28a   :  { %v1990_v32 = vpack.c.bf16 %v1688_v27, %v1686_v25  ;;  %v1626_v6 = vadd.f32 %v1528_v31, %v1324_v28 }
 0x28b   :  { %v1689_v3 = vmax.f32 %v1625_v23, 0.0 }
 0x28c   :  { %v1328_v35 = vpop.f32.mrb[10].mxu1  ;;  %1991 = vmatprep.subr.bf16.mxu1 %v1990_v32  ;;  %v1690_v50 = vmax.f32 %v1626_v6, 0.0  ;;  %v1568_v32 = vpop.permute.xlu0 %1567 }
 0x28d   :  { %v1627_v48 = vadd.f32 %v1533_v40, %v1328_v35  ;;  %v1330_v41 = vpop.f32.mrb[11].mxu1  ;;  %1993 = vmatpush1.bf16.msra.mxu1 %v1992_v22  ;;  %v1573_v6 = vpop.permute.xlu1 %1572 }
 0x28e   :  { %v1628_v49 = vadd.f32 %v1533_v40, %v1330_v41 }
 0x28f   :  { %v1691_v7 = vmax.f32 %v1627_v48, 0.0 }
 0x290   :  { %v1692_v42 = vmax.f32 %v1628_v49, 0.0  ;;  %v1334_v51 = vpop.f32.mrb[12].mxu1 }
 0x291   :  { %v1996_v52 = vpack.c.bf16 %v1691_v7, %v1689_v3  ;;  %v1336_v26 = vpop.f32.mrb[13].mxu1  ;;  %v1629_v10 = vadd.f32 %v1538_v53, %v1334_v51 }
 0x292   :  { %v1994_v43 = vpack.c.bf16 %v1692_v42, %v1690_v50  ;;  %v1630_v56 = vadd.f32 %v1538_v53, %v1336_v26 }
 0x293   :  { %v1693_v11 = vmax.f32 %v1629_v10, 0.0 }
 0x294   :  { %v1340_v57 = vpop.f32.mrb[14].mxu1  ;;  %1995 = vmatprep.subr.bf16.mxu1 %v1994_v43  ;;  %v1694_v45 = vmax.f32 %v1630_v56, 0.0  ;;  %v1578_v43 = vpop.permute.xlu0 %1577 }
 0x295   :  { %v1631_v29 = vadd.f32 %v1543_v55, %v1340_v57  ;;  %v1342_v44 = vpop.f32.mrb[15].mxu1  ;;  %1997 = vmatpush1.bf16.msra.mxu1 %v1996_v52  ;;  %v1583_v56 = vpop.permute.xlu1 %1582 }
 0x296   :  { %v1632_v58 = vadd.f32 %v1543_v55, %v1342_v44 }
 0x297   :  { %v1695_v59 = vmax.f32 %v1631_v29, 0.0 }
 0x298   :  { %v1696_v30 = vmax.f32 %v1632_v58, 0.0  ;;  %v1346_v61 = vpop.f32.mrb[16].mxu1 }
 0x299   :  { %v2000_v60 = vpack.c.bf16 %v1695_v59, %v1693_v11  ;;  %v1348_v63 = vpop.f32.mrb[17].mxu1  ;;  %v1633_v46 = vadd.f32 %v1548_v62, %v1346_v61 }
 0x29a   :  { %v1998_v33 = vpack.c.bf16 %v1696_v30, %v1694_v45  ;;  %v1634_v0 = vadd.f32 %v1548_v62, %v1348_v63  ;;  %v1718_v62 = vpop.permute.xlu0 %1717 }
 0x29b   :  { %v1697_v15 = vmax.f32 %v1633_v46, 0.0 }
 0x29c   :  { %v1352_v4 = vpop.f32.mrb[18].mxu1  ;;  %1999 = vmatprep.subr.bf16.mxu1 %v1998_v33  ;;  %v1698_v9 = vmax.f32 %v1634_v0, 0.0 }
 0x29d   :  { %v1635_v5 = vadd.f32 %v1553_v14, %v1352_v4  ;;  %v1354_v47 = vpop.f32.mrb[19].mxu1  ;;  %2001 = vmatpush1.bf16.msra.mxu1 %v2000_v60 }
 0x29e   :  { %v1636_v34 = vadd.f32 %v1553_v14, %v1354_v47 }
 0x29f   :  { %v1699_v8 = vmax.f32 %v1635_v5, 0.0 }
 0x2a0   :  { %v1700_v12 = vmax.f32 %v1636_v34, 0.0  ;;  %v1358_v13 = vpop.f32.mrb[20].mxu1 }
 0x2a1   :  { %v2004_v36 = vpack.c.bf16 %v1699_v8, %v1697_v15  ;;  %v1360_v18 = vpop.f32.mrb[21].mxu1  ;;  %v1637_v37 = vadd.f32 %v1558_v1, %v1358_v13 }
 0x2a2   :  { %v2002_v16 = vpack.c.bf16 %v1700_v12, %v1698_v9  ;;  %v1638_v20 = vadd.f32 %v1558_v1, %v1360_v18 }
 0x2a3   :  { %v1701_v2 = vmax.f32 %v1637_v37, 0.0 }
 0x2a4   :  { %v1364_v19 = vpop.f32.mrb[22].mxu1  ;;  %2003 = vmatprep.subr.bf16.mxu1 %v2002_v16  ;;  %v1702_v27 = vmax.f32 %v1638_v20, 0.0 }
 0x2a5   :  { %v1639_v21 = vadd.f32 %v1563_v17, %v1364_v19  ;;  %v1366_v38 = vpop.f32.mrb[23].mxu1  ;;  %2005 = vmatpush1.bf16.msra.mxu1 %v2004_v36 }
 0x2a6   :  { %v1640_v24 = vadd.f32 %v1563_v17, %v1366_v38 }
 0x2a7   :  { %v1703_v25 = vmax.f32 %v1639_v21, 0.0 }
 0x2a8   :  { %v1704_v39 = vmax.f32 %v1640_v24, 0.0  ;;  %v1370_v22 = vpop.f32.mrb[24].mxu1 }
 0x2a9   :  { %v2008_v28 = vpack.c.bf16 %v1703_v25, %v1701_v2  ;;  %v1372_v31 = vpop.f32.mrb[25].mxu1  ;;  %v1641_v40 = vadd.f32 %v1568_v32, %v1370_v22 }
 0x2aa   :  { %v2006_v23 = vpack.c.bf16 %v1704_v39, %v1702_v27  ;;  %v1642_v35 = vadd.f32 %v1568_v32, %v1372_v31 }
 0x2ab   :  { %v1705_v7 = vmax.f32 %v1641_v40, 0.0 }
 0x2ac   :  { %v1376_v48 = vpop.f32.mrb[26].mxu1  ;;  %2007 = vmatprep.subr.bf16.mxu1 %v2006_v23  ;;  %v1706_v42 = vmax.f32 %v1642_v35, 0.0 }
 0x2ad   :  { %v1643_v41 = vadd.f32 %v1573_v6, %v1376_v48  ;;  %v1378_v49 = vpop.f32.mrb[27].mxu1  ;;  %2009 = vmatpush1.bf16.msra.mxu1 %v2008_v28 }
 0x2ae   :  { %v1644_v3 = vadd.f32 %v1573_v6, %v1378_v49 }
 0x2af   :  { %v1707_v50 = vmax.f32 %v1643_v41, 0.0 }
 0x2b0   :  { %v1708_v51 = vmax.f32 %v1644_v3, 0.0  ;;  %v1382_v52 = vpop.f32.mrb[28].mxu1 }
 0x2b1   :  { %v2012_v26 = vpack.c.bf16 %v1707_v50, %v1705_v7  ;;  %v1384_v53 = vpop.f32.mrb[29].mxu1  ;;  %v1645_v55 = vadd.f32 %v1578_v43, %v1382_v52 }
 0x2b2   :  { %v2010_v10 = vpack.c.bf16 %v1708_v51, %v1706_v42  ;;  %v1646_v57 = vadd.f32 %v1578_v43, %v1384_v53 }
 0x2b3   :  { %v1709_v59 = vmax.f32 %v1645_v55, 0.0 }
 0x2b4   :  { %v1388_v29 = vpop.f32.mrb[30].mxu1  ;;  %2011 = vmatprep.subr.bf16.mxu1 %v2010_v10  ;;  %v1710_v30 = vmax.f32 %v1646_v57, 0.0 }
 0x2b5   :  { %v1647_v44 = vadd.f32 %v1583_v56, %v1388_v29  ;;  %v1390_v58 = vpop.f32.mrb[31].mxu1  ;;  %2013 = vmatpush1.bf16.msra.mxu1 %v2012_v26 }
 0x2b6   :  { %v1648_v11 = vadd.f32 %v1583_v56, %v1390_v58 }
 0x2b7   :  { %v1711_v45 = vmax.f32 %v1647_v44, 0.0 }
 0x2b8   :  { %v1712_v61 = vmax.f32 %v1648_v11, 0.0 }
 0x2b9   :  { %v2016_v60 = vpack.c.bf16 %v1711_v45, %v1709_v59 }
 0x2ba   :  { %v2014_v63 = vpack.c.bf16 %v1712_v61, %v1710_v30 }
 0x2bc   :  { %2015 = vmatprep.subr.bf16.mxu1 %v2014_v63 }
 0x2bd   :  { %2017 = vmatpush1.bf16.msra.mxu1 %v2016_v60 }
 0x2c0   :  { %1796 = vmatmul.mubr.f32.vlgmr.msra.gmra.mrb[64].mxu1 %v2939_v54 }
 0x393   :  { %v1797_v33 = vpop.f32.mrb[64].mxu1 }
 0x394   :  { %v1798_v46 = vadd.f32 %v1797_v33, %v1718_v62  ;;  %v1799_v14 = vpop.f32.mrb[65].mxu1 }
 0x395   :  { %v1800_v0 = vadd.f32 %v1799_v14, %v1718_v62 }
 0x397   :  { %v1804_v4 = vcombine.low %v1798_v46, %v1800_v0 }
 0x399   :  { %1885 = vst.sshfl [vmem:[%s2985_s8] sm:$0x33 pattern:$0x76325410] %v1804_v4 }

</bundles_post_ra>
